<compile_context>
chip_gen: v7x
topology: tpu7x:2x2x1
jax: 0.10.0
libtpu: 0.0.40
codegen_flags: <defaults>
</compile_context>

<pallas_src>
import functools

import numpy as np
import jax
import jax.numpy as jnp
from jax.experimental import pallas as pl
from jax.experimental.pallas import tpu as pltpu


# ----------------------------- small helpers --------------------------------

def _device_kind():
    try:
        return jax.devices()[0].device_kind.lower()
    except Exception:
        return ""


def _small_matmul(w, x, use_mxu):
    """(M,K) @ (K,L).  VPU broadcast-MAC for tiny K/M, MXU dot otherwise."""
    if use_mxu:
        return jnp.dot(w.astype(x.dtype), x, preferred_element_type=jnp.float32)
    acc = w[:, 0:1] * x[0:1, :]
    for k in range(1, w.shape[1]):
        acc = acc + w[:, k:k + 1] * x[k:k + 1, :]
    return acc


# ------------------------------ fused kernel --------------------------------

def _fused_mbconv_kernel(x_ref, p_ref, m_ref, o_ref, *,
                         H, W, K, pad, Nb, Cin, C, Cout, Se,
                         has_skip, expand, use_bf16, use_mxu):
    """Fused MBConv block for Nb batch elements (eval mode, stride 1).

    Layout: activations are (channels, Nb*HW) — channels on sublanes,
    batch-folded flattened spatial on lanes.
    """
    HW = H * W
    L = Nb * HW
    KK = K * K
    cdt = jnp.bfloat16 if use_bf16 else jnp.float32

    # ---- unpack the single packed parameter block (static column slices) ----
    p = p_ref[...]
    o = 0
    w1 = p[:C, o:o + Cin];      o += Cin        # expansion weight (BN folded)
    b1 = p[:C, o:o + 1];        o += 1          # expansion bias (folded BN)
    wdw = p[:C, o:o + KK];      o += KK         # depthwise taps (BN folded)
    b2 = p[:C, o:o + 1];        o += 1
    se1_wt = p[:C, o:o + Se];   o += Se         # SE squeeze weight (C, Se)
    se1_b = p[:Se, o:o + 1];    o += 1          # SE squeeze bias   (Se, 1)
    se2_w = p[:C, o:o + Se];    o += Se         # SE excite weight  (C, Se)
    se2_b = p[:C, o:o + 1];     o += 1          # SE excite bias    (C, 1)
    w3 = p[:Cout, o:o + C];     o += C          # projection weight (BN folded)
    b3 = p[:Cout, o:o + 1]

    x = x_ref[...]                                                # (Cin, L) f32

    # ---- 1x1 expansion (+ folded BN bias) + swish ----
    if expand:
        h = _small_matmul(w1, x, use_mxu) + b1                    # (C, L) f32
        h = h * jax.nn.sigmoid(h)                                 # swish
    else:
        h = x

    # ---- depthwise KxK conv (stride 1): lane rolls * precomputed masks ----
    # out[c, m] = sum_k w[c, k] * h[c, m + sy*W + sx] (zero outside the image)
    # Rolls stay f32 (XLU); the mask/weight MACs run in `cdt`.
    masks = m_ref[...].astype(cdt)                                # (KK, L)
    wdw_c = wdw.astype(cdt)
    acc = None
    for k in range(KK):                                           # unrolled
        dy, dx = k // K, k % K
        sy, sx = dy - pad, dx - pad
        if sy == 0 and sx == 0:
            tap = h.astype(cdt)                                   # center tap
        else:
            shift = (-(sy * W + sx)) % L                          # static int
            rolled = pltpu.roll(h, shift=shift, axis=1)           # XLU roll
            tap = rolled.astype(cdt) * masks[k:k + 1, :]          # kill wrap
        term = wdw_c[:, k:k + 1] * tap
        acc = term if acc is None else acc + term
    acc = acc + b2.astype(cdt)                                    # folded BN
    h2 = acc * jax.nn.sigmoid(acc)                                # swish (C, L)

    # ---- per-element squeeze-excitation + 1x1 projection (+ residual) ----
    # Unrolled over the Nb batch elements in this block so independent SE
    # chains / projection MACs can overlap.
    for n in range(Nb):
        lo = n * HW
        seg = h2[:, lo:lo + HW]                                   # (C, HW)
        pooled = jnp.mean(seg.astype(jnp.float32), axis=1,
                          keepdims=True)                          # (C, 1) f32
        sacc = se2_b                                              # (C, 1)
        for s in range(Se):                                       # tiny, unrolled
            z = jnp.sum(se1_wt[:, s:s + 1] * pooled, axis=0, keepdims=True)
            z = z + se1_b[s:s + 1, :]                             # (1, 1)
            z = z * jax.nn.sigmoid(z)                             # swish
            sacc = sacc + se2_w[:, s:s + 1] * z
        scale = jax.nn.sigmoid(sacc)                              # (C, 1)
        hs = seg * scale.astype(cdt)                              # (C, HW)

        out = _small_matmul(w3, hs, use_mxu) + b3                 # (Cout, HW) f32
        if has_skip:
            out = out + x[:, lo:lo + HW]
        o_ref[:, lo:lo + HW] = out.astype(o_ref.dtype)


# ----------------------- host-side packing (outside jit) --------------------

def pack_block_params(params, *, kernel_size):
    """Fold eval-mode BN into the conv weights and pack everything into one
    (Cmax, Dtot) f32 array.  Column order must match the kernel unpack order."""
    w1 = params["conv1_w"] * params["bn1_scale"]        # (C, Cin)
    b1 = params["bn1_bias"]                             # (C, 1)
    wdw = params["dw_w"] * params["bn2_scale"]          # (C, K*K)
    b2 = params["bn2_bias"]                             # (C, 1)
    w3 = params["conv3_w"] * params["bn3_scale"]        # (Cout, C)
    b3 = params["bn3_bias"]                             # (Cout, 1)
    se1_wt = params["se1_wt"]                           # (C, Se)
    se1_b = params["se1_b"].reshape(-1, 1)              # (Se, 1)
    se2_w = params["se2_w"]                             # (C, Se)
    se2_b = params["se2_b"]                             # (C, 1)

    C = w1.shape[0]
    Cout = w3.shape[0]
    Se = se1_wt.shape[1]
    Cmax = max(C, Cout, Se)

    cols = []
    for a in (w1, b1, wdw, b2, se1_wt, se1_b, se2_w, se2_b, w3, b3):
        pad_rows = Cmax - a.shape[0]
        if pad_rows:
            a = jnp.concatenate(
                [a, jnp.zeros((pad_rows, a.shape[1]), a.dtype)], axis=0)
        cols.append(a.astype(jnp.float32))
    return jnp.concatenate(cols, axis=1)                # (Cmax, Dtot)


def build_tap_masks(H, W, kernel_size, n_per_step):
    """Precompute the K*K depthwise boundary masks, tiled for n_per_step
    batch elements folded into the lane dimension."""
    K = kernel_size
    pad = 1 if K == 3 else 2
    HW = H * W
    rows = np.arange(HW) // W
    cols = np.arange(HW) % W
    m = []
    for k in range(K * K):
        dy, dx = k // K, k % K
        sy, sx = dy - pad, dx - pad
        valid = ((rows >= -sy) & (rows < H - sy) &
                 (cols >= -sx) & (cols < W - sx))
        m.append(valid.astype(np.float32))
    base = np.stack(m, axis=0)                          # (K*K, HW)
    return jnp.asarray(np.tile(base, (1, n_per_step)))  # (K*K, n_per_step*HW)


# ------------------------------ wrapper (glue) -------------------------------

def block_forward_pallas(x, packed, masks, *, kernel_size=3, stride=1,
                         expand_ratio=2, out_channels=4, se_channels=2,
                         n_per_step=1, use_bf16=False, use_mxu=False):
    # TODO(synk): stride > 1 depthwise variant not implemented (demo uses stride=1)
    assert stride == 1
    N, Cin, H, W = x.shape
    HW = H * W
    C = expand_ratio * Cin
    Cout = out_channels
    Se = se_channels
    K = kernel_size
    KK = K * K
    pad = 1 if K == 3 else 2
    assert N % n_per_step == 0
    G = N // n_per_step                                 # grid steps (<= #TCs)
    L = n_per_step * HW
    has_skip = (stride == 1) and (Cin == Cout)
    Cmax, Dtot = packed.shape
    assert masks.shape == (KK, L)

    # batch folded into lanes: (Cin, N*HW), element n occupies lanes [n*HW,(n+1)*HW)
    x_flat = x.transpose(1, 0, 2, 3).reshape(Cin, N * HW)

    kernel = functools.partial(
        _fused_mbconv_kernel, H=H, W=W, K=K, pad=pad, Nb=n_per_step,
        Cin=Cin, C=C, Cout=Cout, Se=Se, has_skip=has_skip,
        expand=(expand_ratio != 1), use_bf16=use_bf16, use_mxu=use_mxu)

    out = pl.pallas_call(
        kernel,
        out_shape=jax.ShapeDtypeStruct((Cout, N * HW), jnp.float32),
        grid=(G,),
        in_specs=[pl.BlockSpec((Cin, L), lambda g: (0, g)),    # activations
                  pl.BlockSpec((Cmax, Dtot), lambda g: (0, 0)),  # packed params
                  pl.BlockSpec((KK, L), lambda g: (0, 0))],      # tap masks
        out_specs=pl.BlockSpec((Cout, L), lambda g: (0, g)),
        compiler_params=pltpu.CompilerParams(
            dimension_semantics=("parallel",)),
    )(x_flat, packed, masks)

    return out.reshape(Cout, N, HW).transpose(1, 0, 2).reshape(N, Cout, H, W)


# ----------------------- deterministic parameter init -----------------------

def make_params(key, Cin, Cout, C, Se, K):
    eps = 1e-5
    keys = iter(jax.random.split(key, 24))

    def bn_fold(n):
        gamma = 1.0 + 0.1 * jax.random.normal(next(keys), (n,), jnp.float32)
        beta = 0.1 * jax.random.normal(next(keys), (n,), jnp.float32)
        mean = 0.1 * jax.random.normal(next(keys), (n,), jnp.float32)
        var = jax.random.uniform(next(keys), (n,), jnp.float32, 0.5, 1.5)
        scale = gamma / jnp.sqrt(var + eps)           # eval-mode BN folded
        bias = beta - mean * scale
        return scale.reshape(n, 1), bias.reshape(n, 1)

    conv1_w = 0.3 * jax.random.normal(next(keys), (C, Cin), jnp.float32)
    bn1_scale, bn1_bias = bn_fold(C)
    dw_w = 0.3 * jax.random.normal(next(keys), (C, K * K), jnp.float32)
    bn2_scale, bn2_bias = bn_fold(C)
    se1_w = 0.3 * jax.random.normal(next(keys), (Se, C), jnp.float32)
    se1_b = 0.1 * jax.random.normal(next(keys), (Se,), jnp.float32)
    se2_w = 0.3 * jax.random.normal(next(keys), (C, Se), jnp.float32)
    se2_b = 0.1 * jax.random.normal(next(keys), (C,), jnp.float32)
    conv3_w = 0.3 * jax.random.normal(next(keys), (Cout, C), jnp.float32)
    bn3_scale, bn3_bias = bn_fold(Cout)

    return dict(
        conv1_w=conv1_w, bn1_scale=bn1_scale, bn1_bias=bn1_bias,
        dw_w=dw_w, bn2_scale=bn2_scale, bn2_bias=bn2_bias,
        se1_wt=se1_w.T, se1_b=se1_b.reshape(1, Se),
        se2_w=se2_w, se2_b=se2_b.reshape(C, 1),
        conv3_w=conv3_w, bn3_scale=bn3_scale, bn3_bias=bn3_bias,
    )


# ------------------------- pure-JAX reference check --------------------------

def block_forward_ref(x, params, *, kernel_size=3, expand_ratio=2):
    sig = jax.nn.sigmoid
    N, Cin, H, W = x.shape
    if expand_ratio != 1:
        h = jnp.einsum('oi,nihw->nohw', params["conv1_w"], x)
        h = h * params["bn1_scale"].reshape(1, -1, 1, 1) + params["bn1_bias"].reshape(1, -1, 1, 1)
        h = h * sig(h)
    else:
        h = x
    C = h.shape[1]
    pad = 1 if kernel_size == 3 else 2
    hp = jnp.pad(h, ((0, 0), (0, 0), (pad, pad), (pad, pad)))
    wdw = params["dw_w"].reshape(C, kernel_size, kernel_size)
    acc = jnp.zeros_like(h)
    for dy in range(kernel_size):
        for dx in range(kernel_size):
            acc = acc + wdw[:, dy, dx].reshape(1, C, 1, 1) * hp[:, :, dy:dy + H, dx:dx + W]
    acc = acc * params["bn2_scale"].reshape(1, -1, 1, 1) + params["bn2_bias"].reshape(1, -1, 1, 1)
    h = acc * sig(acc)
    pooled = jnp.mean(h, axis=(2, 3))                                  # (N, C)
    z = pooled @ params["se1_wt"] + params["se1_b"]                    # (N, Se)
    z = z * sig(z)
    s = z @ params["se2_w"].T + params["se2_b"][:, 0][None, :]         # (N, C)
    s = sig(s)
    h = h * s[:, :, None, None]
    out = jnp.einsum('oc,nchw->nohw', params["conv3_w"], h)
    out = out * params["bn3_scale"].reshape(1, -1, 1, 1) + params["bn3_bias"].reshape(1, -1, 1, 1)
    if out.shape[1] == Cin:  # stride == 1 and in == out -> skip
        out = out + x
    return out


# ----------------------------------- main ------------------------------------

if __name__ == "__main__":
    # Block(in_channels=4, out_channels=4, kernel_size=3, stride=1,
    #       expand_ratio=2, se_ratio=0.5, drop_rate=0.0), eval mode.
    N, Cin, H, W = 2, 4, 16, 16
    Cout = 4
    kernel_size, stride, expand_ratio, se_ratio = 3, 1, 2, 0.5
    C = expand_ratio * Cin
    Se = int(Cin * se_ratio)

    key = jax.random.PRNGKey(0)
    kx, kp = jax.random.split(key)
    x = jax.random.normal(kx, (N, Cin, H, W), jnp.float32)
    params = make_params(kp, Cin, Cout, C, Se, kernel_size)

    # Device-aware config (heuristic; only affects perf, never correctness):
    #  * 2 grid steps on megacore / v7x-class chips so both TCs get work,
    #    a single grid step otherwise (v5e/v6e have one TC).
    #  * bf16 intermediates only on bf16-VPU chips (v6e / v7x), never on v5e.
    kind = _device_kind()
    two_tc = any(t in kind for t in ("v3", "v4", "v5p", "v7", "7x"))
    bf16_ok = any(t in kind for t in ("v6", "v7", "7x"))
    G = 2 if (two_tc and N % 2 == 0 and N >= 2) else 1
    n_per_step = N // G

    # Host-side, outside jit: BN folding + param packing + depthwise masks.
    packed = pack_block_params(params, kernel_size=kernel_size)
    masks = build_tap_masks(H, W, kernel_size, n_per_step)

    ref = block_forward_ref(x, params, kernel_size=kernel_size,
                            expand_ratio=expand_ratio)

    def make_fwd(use_bf16):
        return jax.jit(functools.partial(
            block_forward_pallas, kernel_size=kernel_size, stride=stride,
            expand_ratio=expand_ratio, out_channels=Cout, se_channels=Se,
            n_per_step=n_per_step, use_bf16=use_bf16, use_mxu=False))

    # f32 path: tight correctness check against the pure-JAX reference.
    out = make_fwd(False)(x, packed, masks)
    jax.block_until_ready(out)
    assert out.shape == (N, Cout, H, W), out.shape
    err = float(jnp.max(jnp.abs(out - ref)))
    assert err < 2e-3, f"f32 max abs error {err}"

    # bf16-intermediate fast path (v6e/v7x only): looser tolerance since the
    # depthwise taps / swish / SE rescale carry bf16 (~0.4% per op).
    if bf16_ok:
        out_b = make_fwd(True)(x, packed, masks)
        jax.block_until_ready(out_b)
        err_b = float(jnp.max(jnp.abs(out_b - ref)))
        assert err_b < 1.5e-1, f"bf16 max abs error {err_b}"

    print("KERNEL_OK")
</pallas_src>

<mosaic_0001>
module attributes {stable_mosaic.version = 11 : i64} {
  func.func @_fused_mbconv_kernel(%arg0: i32, %arg1: memref<4x512xf32, #tpu.memory_space<vmem>>, %arg2: memref<8x30xf32, #tpu.memory_space<vmem>>, %arg3: memref<9x512xf32, #tpu.memory_space<vmem>>, %arg4: memref<4x512xf32, #tpu.memory_space<vmem>>) attributes {dimension_semantics = [#tpu.dimension_semantics<parallel>], iteration_bounds = array<i64: 1>, scalar_prefetch = 0 : i64, scratch_operands = 0 : i64, tpu.core_type = #tpu.core_type<tc>, window_params = [{transform_indices = @transform_0, window_bounds = array<i64: 4, 512>}, {pipeline_mode = #tpu.pipeline_mode<synchronous>, transform_indices = @transform_1, window_bounds = array<i64: 8, 30>}, {pipeline_mode = #tpu.pipeline_mode<synchronous>, transform_indices = @transform_2, window_bounds = array<i64: 9, 512>}, {transform_indices = @transform_3, window_bounds = array<i64: 4, 512>}]} {
    %c0 = arith.constant 0 : index
    %c0_0 = arith.constant 0 : index
    %0 = vector.load %arg2[%c0, %c0_0] : memref<8x30xf32, #tpu.memory_space<vmem>>, vector<8x30xf32>
    %1 = vector.extract_strided_slice %0 {offsets = [0, 0], sizes = [8, 4], strides = [1, 1]} : vector<8x30xf32> to vector<8x4xf32>
    %2 = vector.extract_strided_slice %0 {offsets = [0, 4], sizes = [8, 1], strides = [1, 1]} : vector<8x30xf32> to vector<8x1xf32>
    %3 = vector.extract_strided_slice %0 {offsets = [0, 5], sizes = [8, 9], strides = [1, 1]} : vector<8x30xf32> to vector<8x9xf32>
    %4 = vector.extract_strided_slice %0 {offsets = [0, 14], sizes = [8, 1], strides = [1, 1]} : vector<8x30xf32> to vector<8x1xf32>
    %5 = vector.extract_strided_slice %0 {offsets = [0, 15], sizes = [8, 2], strides = [1, 1]} : vector<8x30xf32> to vector<8x2xf32>
    %6 = vector.extract_strided_slice %0 {offsets = [0, 17], sizes = [2, 1], strides = [1, 1]} : vector<8x30xf32> to vector<2x1xf32>
    %7 = vector.extract_strided_slice %0 {offsets = [0, 18], sizes = [8, 2], strides = [1, 1]} : vector<8x30xf32> to vector<8x2xf32>
    %8 = vector.extract_strided_slice %0 {offsets = [0, 20], sizes = [8, 1], strides = [1, 1]} : vector<8x30xf32> to vector<8x1xf32>
    %9 = vector.extract_strided_slice %0 {offsets = [0, 21], sizes = [4, 8], strides = [1, 1]} : vector<8x30xf32> to vector<4x8xf32>
    %10 = vector.extract_strided_slice %0 {offsets = [0, 29], sizes = [4, 1], strides = [1, 1]} : vector<8x30xf32> to vector<4x1xf32>
    %c0_1 = arith.constant 0 : index
    %c0_2 = arith.constant 0 : index
    %11 = vector.load %arg1[%c0_1, %c0_2] : memref<4x512xf32, #tpu.memory_space<vmem>>, vector<4x512xf32>
    %12 = vector.extract_strided_slice %1 {offsets = [0, 0], sizes = [8, 1], strides = [1, 1]} : vector<8x4xf32> to vector<8x1xf32>
    %13 = vector.extract_strided_slice %11 {offsets = [0, 0], sizes = [1, 512], strides = [1, 1]} : vector<4x512xf32> to vector<1x512xf32>
    %14 = vector.broadcast %12 : vector<8x1xf32> to vector<8x512xf32>
    %15 = vector.broadcast %13 : vector<1x512xf32> to vector<8x512xf32>
    %16 = arith.mulf %14, %15 : vector<8x512xf32>
    %17 = vector.extract_strided_slice %1 {offsets = [0, 1], sizes = [8, 1], strides = [1, 1]} : vector<8x4xf32> to vector<8x1xf32>
    %18 = vector.extract_strided_slice %11 {offsets = [1, 0], sizes = [1, 512], strides = [1, 1]} : vector<4x512xf32> to vector<1x512xf32>
    %19 = vector.broadcast %17 : vector<8x1xf32> to vector<8x512xf32>
    %20 = vector.broadcast %18 : vector<1x512xf32> to vector<8x512xf32>
    %21 = arith.mulf %19, %20 : vector<8x512xf32>
    %22 = arith.addf %16, %21 : vector<8x512xf32>
    %23 = vector.extract_strided_slice %1 {offsets = [0, 2], sizes = [8, 1], strides = [1, 1]} : vector<8x4xf32> to vector<8x1xf32>
    %24 = vector.extract_strided_slice %11 {offsets = [2, 0], sizes = [1, 512], strides = [1, 1]} : vector<4x512xf32> to vector<1x512xf32>
    %25 = vector.broadcast %23 : vector<8x1xf32> to vector<8x512xf32>
    %26 = vector.broadcast %24 : vector<1x512xf32> to vector<8x512xf32>
    %27 = arith.mulf %25, %26 : vector<8x512xf32>
    %28 = arith.addf %22, %27 : vector<8x512xf32>
    %29 = vector.extract_strided_slice %1 {offsets = [0, 3], sizes = [8, 1], strides = [1, 1]} : vector<8x4xf32> to vector<8x1xf32>
    %30 = vector.extract_strided_slice %11 {offsets = [3, 0], sizes = [1, 512], strides = [1, 1]} : vector<4x512xf32> to vector<1x512xf32>
    %31 = vector.broadcast %29 : vector<8x1xf32> to vector<8x512xf32>
    %32 = vector.broadcast %30 : vector<1x512xf32> to vector<8x512xf32>
    %33 = arith.mulf %31, %32 : vector<8x512xf32>
    %34 = arith.addf %28, %33 : vector<8x512xf32>
    %35 = vector.broadcast %2 : vector<8x1xf32> to vector<8x512xf32>
    %36 = arith.addf %34, %35 : vector<8x512xf32>
    %37 = arith.negf %36 : vector<8x512xf32>
    %38 = math.exp %37 : vector<8x512xf32>
    %cst = arith.constant 1.000000e+00 : f32
    %39 = vector.broadcast %cst : f32 to vector<8x512xf32>
    %40 = arith.addf %39, %38 : vector<8x512xf32>
    %41 = arith.divf %39, %40 : vector<8x512xf32>
    %42 = arith.mulf %36, %41 : vector<8x512xf32>
    %c0_3 = arith.constant 0 : index
    %c0_4 = arith.constant 0 : index
    %43 = vector.load %arg3[%c0_3, %c0_4] : memref<9x512xf32, #tpu.memory_space<vmem>>, vector<9x512xf32>
    %c17_i32 = arith.constant 17 : i32
    %44 = tpu.dynamic_rotate %42 by %c17_i32 dim 1 : vector<8x512xf32>, i32 -> vector<8x512xf32>
    %45 = vector.extract_strided_slice %43 {offsets = [0, 0], sizes = [1, 512], strides = [1, 1]} : vector<9x512xf32> to vector<1x512xf32>
    %46 = vector.broadcast %45 : vector<1x512xf32> to vector<8x512xf32>
    %47 = arith.mulf %44, %46 : vector<8x512xf32>
    %48 = vector.extract_strided_slice %3 {offsets = [0, 0], sizes = [8, 1], strides = [1, 1]} : vector<8x9xf32> to vector<8x1xf32>
    %49 = vector.broadcast %48 : vector<8x1xf32> to vector<8x512xf32>
    %50 = arith.mulf %49, %47 : vector<8x512xf32>
    %c16_i32 = arith.constant 16 : i32
    %51 = tpu.dynamic_rotate %42 by %c16_i32 dim 1 : vector<8x512xf32>, i32 -> vector<8x512xf32>
    %52 = vector.extract_strided_slice %43 {offsets = [1, 0], sizes = [1, 512], strides = [1, 1]} : vector<9x512xf32> to vector<1x512xf32>
    %53 = vector.broadcast %52 : vector<1x512xf32> to vector<8x512xf32>
    %54 = arith.mulf %51, %53 : vector<8x512xf32>
    %55 = vector.extract_strided_slice %3 {offsets = [0, 1], sizes = [8, 1], strides = [1, 1]} : vector<8x9xf32> to vector<8x1xf32>
    %56 = vector.broadcast %55 : vector<8x1xf32> to vector<8x512xf32>
    %57 = arith.mulf %56, %54 : vector<8x512xf32>
    %58 = arith.addf %50, %57 : vector<8x512xf32>
    %c15_i32 = arith.constant 15 : i32
    %59 = tpu.dynamic_rotate %42 by %c15_i32 dim 1 : vector<8x512xf32>, i32 -> vector<8x512xf32>
    %60 = vector.extract_strided_slice %43 {offsets = [2, 0], sizes = [1, 512], strides = [1, 1]} : vector<9x512xf32> to vector<1x512xf32>
    %61 = vector.broadcast %60 : vector<1x512xf32> to vector<8x512xf32>
    %62 = arith.mulf %59, %61 : vector<8x512xf32>
    %63 = vector.extract_strided_slice %3 {offsets = [0, 2], sizes = [8, 1], strides = [1, 1]} : vector<8x9xf32> to vector<8x1xf32>
    %64 = vector.broadcast %63 : vector<8x1xf32> to vector<8x512xf32>
    %65 = arith.mulf %64, %62 : vector<8x512xf32>
    %66 = arith.addf %58, %65 : vector<8x512xf32>
    %c1_i32 = arith.constant 1 : i32
    %67 = tpu.dynamic_rotate %42 by %c1_i32 dim 1 : vector<8x512xf32>, i32 -> vector<8x512xf32>
    %68 = vector.extract_strided_slice %43 {offsets = [3, 0], sizes = [1, 512], strides = [1, 1]} : vector<9x512xf32> to vector<1x512xf32>
    %69 = vector.broadcast %68 : vector<1x512xf32> to vector<8x512xf32>
    %70 = arith.mulf %67, %69 : vector<8x512xf32>
    %71 = vector.extract_strided_slice %3 {offsets = [0, 3], sizes = [8, 1], strides = [1, 1]} : vector<8x9xf32> to vector<8x1xf32>
    %72 = vector.broadcast %71 : vector<8x1xf32> to vector<8x512xf32>
    %73 = arith.mulf %72, %70 : vector<8x512xf32>
    %74 = arith.addf %66, %73 : vector<8x512xf32>
    %75 = vector.extract_strided_slice %3 {offsets = [0, 4], sizes = [8, 1], strides = [1, 1]} : vector<8x9xf32> to vector<8x1xf32>
    %76 = vector.broadcast %75 : vector<8x1xf32> to vector<8x512xf32>
    %77 = arith.mulf %76, %42 : vector<8x512xf32>
    %78 = arith.addf %74, %77 : vector<8x512xf32>
    %c511_i32 = arith.constant 511 : i32
    %79 = tpu.dynamic_rotate %42 by %c511_i32 dim 1 : vector<8x512xf32>, i32 -> vector<8x512xf32>
    %80 = vector.extract_strided_slice %43 {offsets = [5, 0], sizes = [1, 512], strides = [1, 1]} : vector<9x512xf32> to vector<1x512xf32>
    %81 = vector.broadcast %80 : vector<1x512xf32> to vector<8x512xf32>
    %82 = arith.mulf %79, %81 : vector<8x512xf32>
    %83 = vector.extract_strided_slice %3 {offsets = [0, 5], sizes = [8, 1], strides = [1, 1]} : vector<8x9xf32> to vector<8x1xf32>
    %84 = vector.broadcast %83 : vector<8x1xf32> to vector<8x512xf32>
    %85 = arith.mulf %84, %82 : vector<8x512xf32>
    %86 = arith.addf %78, %85 : vector<8x512xf32>
    %c497_i32 = arith.constant 497 : i32
    %87 = tpu.dynamic_rotate %42 by %c497_i32 dim 1 : vector<8x512xf32>, i32 -> vector<8x512xf32>
    %88 = vector.extract_strided_slice %43 {offsets = [6, 0], sizes = [1, 512], strides = [1, 1]} : vector<9x512xf32> to vector<1x512xf32>
    %89 = vector.broadcast %88 : vector<1x512xf32> to vector<8x512xf32>
    %90 = arith.mulf %87, %89 : vector<8x512xf32>
    %91 = vector.extract_strided_slice %3 {offsets = [0, 6], sizes = [8, 1], strides = [1, 1]} : vector<8x9xf32> to vector<8x1xf32>
    %92 = vector.broadcast %91 : vector<8x1xf32> to vector<8x512xf32>
    %93 = arith.mulf %92, %90 : vector<8x512xf32>
    %94 = arith.addf %86, %93 : vector<8x512xf32>
    %c496_i32 = arith.constant 496 : i32
    %95 = tpu.dynamic_rotate %42 by %c496_i32 dim 1 : vector<8x512xf32>, i32 -> vector<8x512xf32>
    %96 = vector.extract_strided_slice %43 {offsets = [7, 0], sizes = [1, 512], strides = [1, 1]} : vector<9x512xf32> to vector<1x512xf32>
    %97 = vector.broadcast %96 : vector<1x512xf32> to vector<8x512xf32>
    %98 = arith.mulf %95, %97 : vector<8x512xf32>
    %99 = vector.extract_strided_slice %3 {offsets = [0, 7], sizes = [8, 1], strides = [1, 1]} : vector<8x9xf32> to vector<8x1xf32>
    %100 = vector.broadcast %99 : vector<8x1xf32> to vector<8x512xf32>
    %101 = arith.mulf %100, %98 : vector<8x512xf32>
    %102 = arith.addf %94, %101 : vector<8x512xf32>
    %c495_i32 = arith.constant 495 : i32
    %103 = tpu.dynamic_rotate %42 by %c495_i32 dim 1 : vector<8x512xf32>, i32 -> vector<8x512xf32>
    %104 = vector.extract_strided_slice %43 {offsets = [8, 0], sizes = [1, 512], strides = [1, 1]} : vector<9x512xf32> to vector<1x512xf32>
    %105 = vector.broadcast %104 : vector<1x512xf32> to vector<8x512xf32>
    %106 = arith.mulf %103, %105 : vector<8x512xf32>
    %107 = vector.extract_strided_slice %3 {offsets = [0, 8], sizes = [8, 1], strides = [1, 1]} : vector<8x9xf32> to vector<8x1xf32>
    %108 = vector.broadcast %107 : vector<8x1xf32> to vector<8x512xf32>
    %109 = arith.mulf %108, %106 : vector<8x512xf32>
    %110 = arith.addf %102, %109 : vector<8x512xf32>
    %111 = vector.broadcast %4 : vector<8x1xf32> to vector<8x512xf32>
    %112 = arith.addf %110, %111 : vector<8x512xf32>
    %113 = arith.negf %112 : vector<8x512xf32>
    %114 = math.exp %113 : vector<8x512xf32>
    %cst_5 = arith.constant 1.000000e+00 : f32
    %115 = vector.broadcast %cst_5 : f32 to vector<8x512xf32>
    %116 = arith.addf %115, %114 : vector<8x512xf32>
    %117 = arith.divf %115, %116 : vector<8x512xf32>
    %118 = arith.mulf %112, %117 : vector<8x512xf32>
    %119 = vector.extract_strided_slice %118 {offsets = [0, 0], sizes = [8, 256], strides = [1, 1]} : vector<8x512xf32> to vector<8x256xf32>
    %cst_6 = arith.constant dense<0.000000e+00> : vector<8xf32>
    %120 = vector.multi_reduction <add>, %119, %cst_6 [1] : vector<8x256xf32> to vector<8xf32>
    %121 = vector.shape_cast %120 : vector<8xf32> to vector<8x1xf32>
    %cst_7 = arith.constant 2.560000e+02 : f32
    %122 = vector.broadcast %cst_7 : f32 to vector<8x1xf32>
    %123 = arith.divf %121, %122 : vector<8x1xf32>
    %124 = vector.extract_strided_slice %5 {offsets = [0, 0], sizes = [8, 1], strides = [1, 1]} : vector<8x2xf32> to vector<8x1xf32>
    %125 = arith.mulf %124, %123 : vector<8x1xf32>
    %cst_8 = arith.constant dense<0.000000e+00> : vector<1xf32>
    %126 = vector.multi_reduction <add>, %125, %cst_8 [0] : vector<8x1xf32> to vector<1xf32>
    %127 = vector.shape_cast %126 : vector<1xf32> to vector<1x1xf32>
    %128 = vector.extract_strided_slice %6 {offsets = [0, 0], sizes = [1, 1], strides = [1, 1]} : vector<2x1xf32> to vector<1x1xf32>
    %129 = arith.addf %127, %128 : vector<1x1xf32>
    %130 = arith.negf %129 : vector<1x1xf32>
    %131 = math.exp %130 : vector<1x1xf32>
    %cst_9 = arith.constant 1.000000e+00 : f32
    %132 = vector.broadcast %cst_9 : f32 to vector<1x1xf32>
    %133 = arith.addf %132, %131 : vector<1x1xf32>
    %134 = arith.divf %132, %133 : vector<1x1xf32>
    %135 = arith.mulf %129, %134 : vector<1x1xf32>
    %136 = vector.extract_strided_slice %7 {offsets = [0, 0], sizes = [8, 1], strides = [1, 1]} : vector<8x2xf32> to vector<8x1xf32>
    %137 = vector.broadcast %135 : vector<1x1xf32> to vector<8x1xf32>
    %138 = arith.mulf %136, %137 : vector<8x1xf32>
    %139 = arith.addf %8, %138 : vector<8x1xf32>
    %140 = vector.extract_strided_slice %5 {offsets = [0, 1], sizes = [8, 1], strides = [1, 1]} : vector<8x2xf32> to vector<8x1xf32>
    %141 = arith.mulf %140, %123 : vector<8x1xf32>
    %cst_10 = arith.constant dense<0.000000e+00> : vector<1xf32>
    %142 = vector.multi_reduction <add>, %141, %cst_10 [0] : vector<8x1xf32> to vector<1xf32>
    %143 = vector.shape_cast %142 : vector<1xf32> to vector<1x1xf32>
    %144 = vector.extract_strided_slice %6 {offsets = [1, 0], sizes = [1, 1], strides = [1, 1]} : vector<2x1xf32> to vector<1x1xf32>
    %145 = arith.addf %143, %144 : vector<1x1xf32>
    %146 = arith.negf %145 : vector<1x1xf32>
    %147 = math.exp %146 : vector<1x1xf32>
    %cst_11 = arith.constant 1.000000e+00 : f32
    %148 = vector.broadcast %cst_11 : f32 to vector<1x1xf32>
    %149 = arith.addf %148, %147 : vector<1x1xf32>
    %150 = arith.divf %148, %149 : vector<1x1xf32>
    %151 = arith.mulf %145, %150 : vector<1x1xf32>
    %152 = vector.extract_strided_slice %7 {offsets = [0, 1], sizes = [8, 1], strides = [1, 1]} : vector<8x2xf32> to vector<8x1xf32>
    %153 = vector.broadcast %151 : vector<1x1xf32> to vector<8x1xf32>
    %154 = arith.mulf %152, %153 : vector<8x1xf32>
    %155 = arith.addf %139, %154 : vector<8x1xf32>
    %156 = arith.negf %155 : vector<8x1xf32>
    %157 = math.exp %156 : vector<8x1xf32>
    %cst_12 = arith.constant 1.000000e+00 : f32
    %158 = vector.broadcast %cst_12 : f32 to vector<8x1xf32>
    %159 = arith.addf %158, %157 : vector<8x1xf32>
    %160 = arith.divf %158, %159 : vector<8x1xf32>
    %161 = vector.broadcast %160 : vector<8x1xf32> to vector<8x256xf32>
    %162 = arith.mulf %119, %161 : vector<8x256xf32>
    %163 = vector.extract_strided_slice %9 {offsets = [0, 0], sizes = [4, 1], strides = [1, 1]} : vector<4x8xf32> to vector<4x1xf32>
    %164 = vector.extract_strided_slice %162 {offsets = [0, 0], sizes = [1, 256], strides = [1, 1]} : vector<8x256xf32> to vector<1x256xf32>
    %165 = vector.broadcast %163 : vector<4x1xf32> to vector<4x256xf32>
    %166 = vector.broadcast %164 : vector<1x256xf32> to vector<4x256xf32>
    %167 = arith.mulf %165, %166 : vector<4x256xf32>
    %168 = vector.extract_strided_slice %9 {offsets = [0, 1], sizes = [4, 1], strides = [1, 1]} : vector<4x8xf32> to vector<4x1xf32>
    %169 = vector.extract_strided_slice %162 {offsets = [1, 0], sizes = [1, 256], strides = [1, 1]} : vector<8x256xf32> to vector<1x256xf32>
    %170 = vector.broadcast %168 : vector<4x1xf32> to vector<4x256xf32>
    %171 = vector.broadcast %169 : vector<1x256xf32> to vector<4x256xf32>
    %172 = arith.mulf %170, %171 : vector<4x256xf32>
    %173 = arith.addf %167, %172 : vector<4x256xf32>
    %174 = vector.extract_strided_slice %9 {offsets = [0, 2], sizes = [4, 1], strides = [1, 1]} : vector<4x8xf32> to vector<4x1xf32>
    %175 = vector.extract_strided_slice %162 {offsets = [2, 0], sizes = [1, 256], strides = [1, 1]} : vector<8x256xf32> to vector<1x256xf32>
    %176 = vector.broadcast %174 : vector<4x1xf32> to vector<4x256xf32>
    %177 = vector.broadcast %175 : vector<1x256xf32> to vector<4x256xf32>
    %178 = arith.mulf %176, %177 : vector<4x256xf32>
    %179 = arith.addf %173, %178 : vector<4x256xf32>
    %180 = vector.extract_strided_slice %9 {offsets = [0, 3], sizes = [4, 1], strides = [1, 1]} : vector<4x8xf32> to vector<4x1xf32>
    %181 = vector.extract_strided_slice %162 {offsets = [3, 0], sizes = [1, 256], strides = [1, 1]} : vector<8x256xf32> to vector<1x256xf32>
    %182 = vector.broadcast %180 : vector<4x1xf32> to vector<4x256xf32>
    %183 = vector.broadcast %181 : vector<1x256xf32> to vector<4x256xf32>
    %184 = arith.mulf %182, %183 : vector<4x256xf32>
    %185 = arith.addf %179, %184 : vector<4x256xf32>
    %186 = vector.extract_strided_slice %9 {offsets = [0, 4], sizes = [4, 1], strides = [1, 1]} : vector<4x8xf32> to vector<4x1xf32>
    %187 = vector.extract_strided_slice %162 {offsets = [4, 0], sizes = [1, 256], strides = [1, 1]} : vector<8x256xf32> to vector<1x256xf32>
    %188 = vector.broadcast %186 : vector<4x1xf32> to vector<4x256xf32>
    %189 = vector.broadcast %187 : vector<1x256xf32> to vector<4x256xf32>
    %190 = arith.mulf %188, %189 : vector<4x256xf32>
    %191 = arith.addf %185, %190 : vector<4x256xf32>
    %192 = vector.extract_strided_slice %9 {offsets = [0, 5], sizes = [4, 1], strides = [1, 1]} : vector<4x8xf32> to vector<4x1xf32>
    %193 = vector.extract_strided_slice %162 {offsets = [5, 0], sizes = [1, 256], strides = [1, 1]} : vector<8x256xf32> to vector<1x256xf32>
    %194 = vector.broadcast %192 : vector<4x1xf32> to vector<4x256xf32>
    %195 = vector.broadcast %193 : vector<1x256xf32> to vector<4x256xf32>
    %196 = arith.mulf %194, %195 : vector<4x256xf32>
    %197 = arith.addf %191, %196 : vector<4x256xf32>
    %198 = vector.extract_strided_slice %9 {offsets = [0, 6], sizes = [4, 1], strides = [1, 1]} : vector<4x8xf32> to vector<4x1xf32>
    %199 = vector.extract_strided_slice %162 {offsets = [6, 0], sizes = [1, 256], strides = [1, 1]} : vector<8x256xf32> to vector<1x256xf32>
    %200 = vector.broadcast %198 : vector<4x1xf32> to vector<4x256xf32>
    %201 = vector.broadcast %199 : vector<1x256xf32> to vector<4x256xf32>
    %202 = arith.mulf %200, %201 : vector<4x256xf32>
    %203 = arith.addf %197, %202 : vector<4x256xf32>
    %204 = vector.extract_strided_slice %9 {offsets = [0, 7], sizes = [4, 1], strides = [1, 1]} : vector<4x8xf32> to vector<4x1xf32>
    %205 = vector.extract_strided_slice %162 {offsets = [7, 0], sizes = [1, 256], strides = [1, 1]} : vector<8x256xf32> to vector<1x256xf32>
    %206 = vector.broadcast %204 : vector<4x1xf32> to vector<4x256xf32>
    %207 = vector.broadcast %205 : vector<1x256xf32> to vector<4x256xf32>
    %208 = arith.mulf %206, %207 : vector<4x256xf32>
    %209 = arith.addf %203, %208 : vector<4x256xf32>
    %210 = vector.broadcast %10 : vector<4x1xf32> to vector<4x256xf32>
    %211 = arith.addf %209, %210 : vector<4x256xf32>
    %212 = vector.extract_strided_slice %11 {offsets = [0, 0], sizes = [4, 256], strides = [1, 1]} : vector<4x512xf32> to vector<4x256xf32>
    %213 = arith.addf %211, %212 : vector<4x256xf32>
    %c0_13 = arith.constant 0 : index
    %c0_14 = arith.constant 0 : index
    %214 = vector.load %arg4[%c0_13, %c0_14] : memref<4x512xf32, #tpu.memory_space<vmem>>, vector<4x256xf32>
    tpu.vector_store %arg4[%c0_13, %c0_14], %213 {strides = array<i32>} : memref<4x512xf32, #tpu.memory_space<vmem>>, vector<4x256xf32>,
    %215 = vector.extract_strided_slice %118 {offsets = [0, 256], sizes = [8, 256], strides = [1, 1]} : vector<8x512xf32> to vector<8x256xf32>
    %cst_15 = arith.constant dense<0.000000e+00> : vector<8xf32>
    %216 = vector.multi_reduction <add>, %215, %cst_15 [1] : vector<8x256xf32> to vector<8xf32>
    %217 = vector.shape_cast %216 : vector<8xf32> to vector<8x1xf32>
    %cst_16 = arith.constant 2.560000e+02 : f32
    %218 = vector.broadcast %cst_16 : f32 to vector<8x1xf32>
    %219 = arith.divf %217, %218 : vector<8x1xf32>
    %220 = vector.extract_strided_slice %5 {offsets = [0, 0], sizes = [8, 1], strides = [1, 1]} : vector<8x2xf32> to vector<8x1xf32>
    %221 = arith.mulf %220, %219 : vector<8x1xf32>
    %cst_17 = arith.constant dense<0.000000e+00> : vector<1xf32>
    %222 = vector.multi_reduction <add>, %221, %cst_17 [0] : vector<8x1xf32> to vector<1xf32>
    %223 = vector.shape_cast %222 : vector<1xf32> to vector<1x1xf32>
    %224 = vector.extract_strided_slice %6 {offsets = [0, 0], sizes = [1, 1], strides = [1, 1]} : vector<2x1xf32> to vector<1x1xf32>
    %225 = arith.addf %223, %224 : vector<1x1xf32>
    %226 = arith.negf %225 : vector<1x1xf32>
    %227 = math.exp %226 : vector<1x1xf32>
    %cst_18 = arith.constant 1.000000e+00 : f32
    %228 = vector.broadcast %cst_18 : f32 to vector<1x1xf32>
    %229 = arith.addf %228, %227 : vector<1x1xf32>
    %230 = arith.divf %228, %229 : vector<1x1xf32>
    %231 = arith.mulf %225, %230 : vector<1x1xf32>
    %232 = vector.extract_strided_slice %7 {offsets = [0, 0], sizes = [8, 1], strides = [1, 1]} : vector<8x2xf32> to vector<8x1xf32>
    %233 = vector.broadcast %231 : vector<1x1xf32> to vector<8x1xf32>
    %234 = arith.mulf %232, %233 : vector<8x1xf32>
    %235 = arith.addf %8, %234 : vector<8x1xf32>
    %236 = vector.extract_strided_slice %5 {offsets = [0, 1], sizes = [8, 1], strides = [1, 1]} : vector<8x2xf32> to vector<8x1xf32>
    %237 = arith.mulf %236, %219 : vector<8x1xf32>
    %cst_19 = arith.constant dense<0.000000e+00> : vector<1xf32>
    %238 = vector.multi_reduction <add>, %237, %cst_19 [0] : vector<8x1xf32> to vector<1xf32>
    %239 = vector.shape_cast %238 : vector<1xf32> to vector<1x1xf32>
    %240 = vector.extract_strided_slice %6 {offsets = [1, 0], sizes = [1, 1], strides = [1, 1]} : vector<2x1xf32> to vector<1x1xf32>
    %241 = arith.addf %239, %240 : vector<1x1xf32>
    %242 = arith.negf %241 : vector<1x1xf32>
    %243 = math.exp %242 : vector<1x1xf32>
    %cst_20 = arith.constant 1.000000e+00 : f32
    %244 = vector.broadcast %cst_20 : f32 to vector<1x1xf32>
    %245 = arith.addf %244, %243 : vector<1x1xf32>
    %246 = arith.divf %244, %245 : vector<1x1xf32>
    %247 = arith.mulf %241, %246 : vector<1x1xf32>
    %248 = vector.extract_strided_slice %7 {offsets = [0, 1], sizes = [8, 1], strides = [1, 1]} : vector<8x2xf32> to vector<8x1xf32>
    %249 = vector.broadcast %247 : vector<1x1xf32> to vector<8x1xf32>
    %250 = arith.mulf %248, %249 : vector<8x1xf32>
    %251 = arith.addf %235, %250 : vector<8x1xf32>
    %252 = arith.negf %251 : vector<8x1xf32>
    %253 = math.exp %252 : vector<8x1xf32>
    %cst_21 = arith.constant 1.000000e+00 : f32
    %254 = vector.broadcast %cst_21 : f32 to vector<8x1xf32>
    %255 = arith.addf %254, %253 : vector<8x1xf32>
    %256 = arith.divf %254, %255 : vector<8x1xf32>
    %257 = vector.broadcast %256 : vector<8x1xf32> to vector<8x256xf32>
    %258 = arith.mulf %215, %257 : vector<8x256xf32>
    %259 = vector.extract_strided_slice %9 {offsets = [0, 0], sizes = [4, 1], strides = [1, 1]} : vector<4x8xf32> to vector<4x1xf32>
    %260 = vector.extract_strided_slice %258 {offsets = [0, 0], sizes = [1, 256], strides = [1, 1]} : vector<8x256xf32> to vector<1x256xf32>
    %261 = vector.broadcast %259 : vector<4x1xf32> to vector<4x256xf32>
    %262 = vector.broadcast %260 : vector<1x256xf32> to vector<4x256xf32>
    %263 = arith.mulf %261, %262 : vector<4x256xf32>
    %264 = vector.extract_strided_slice %9 {offsets = [0, 1], sizes = [4, 1], strides = [1, 1]} : vector<4x8xf32> to vector<4x1xf32>
    %265 = vector.extract_strided_slice %258 {offsets = [1, 0], sizes = [1, 256], strides = [1, 1]} : vector<8x256xf32> to vector<1x256xf32>
    %266 = vector.broadcast %264 : vector<4x1xf32> to vector<4x256xf32>
    %267 = vector.broadcast %265 : vector<1x256xf32> to vector<4x256xf32>
    %268 = arith.mulf %266, %267 : vector<4x256xf32>
    %269 = arith.addf %263, %268 : vector<4x256xf32>
    %270 = vector.extract_strided_slice %9 {offsets = [0, 2], sizes = [4, 1], strides = [1, 1]} : vector<4x8xf32> to vector<4x1xf32>
    %271 = vector.extract_strided_slice %258 {offsets = [2, 0], sizes = [1, 256], strides = [1, 1]} : vector<8x256xf32> to vector<1x256xf32>
    %272 = vector.broadcast %270 : vector<4x1xf32> to vector<4x256xf32>
    %273 = vector.broadcast %271 : vector<1x256xf32> to vector<4x256xf32>
    %274 = arith.mulf %272, %273 : vector<4x256xf32>
    %275 = arith.addf %269, %274 : vector<4x256xf32>
    %276 = vector.extract_strided_slice %9 {offsets = [0, 3], sizes = [4, 1], strides = [1, 1]} : vector<4x8xf32> to vector<4x1xf32>
    %277 = vector.extract_strided_slice %258 {offsets = [3, 0], sizes = [1, 256], strides = [1, 1]} : vector<8x256xf32> to vector<1x256xf32>
    %278 = vector.broadcast %276 : vector<4x1xf32> to vector<4x256xf32>
    %279 = vector.broadcast %277 : vector<1x256xf32> to vector<4x256xf32>
    %280 = arith.mulf %278, %279 : vector<4x256xf32>
    %281 = arith.addf %275, %280 : vector<4x256xf32>
    %282 = vector.extract_strided_slice %9 {offsets = [0, 4], sizes = [4, 1], strides = [1, 1]} : vector<4x8xf32> to vector<4x1xf32>
    %283 = vector.extract_strided_slice %258 {offsets = [4, 0], sizes = [1, 256], strides = [1, 1]} : vector<8x256xf32> to vector<1x256xf32>
    %284 = vector.broadcast %282 : vector<4x1xf32> to vector<4x256xf32>
    %285 = vector.broadcast %283 : vector<1x256xf32> to vector<4x256xf32>
    %286 = arith.mulf %284, %285 : vector<4x256xf32>
    %287 = arith.addf %281, %286 : vector<4x256xf32>
    %288 = vector.extract_strided_slice %9 {offsets = [0, 5], sizes = [4, 1], strides = [1, 1]} : vector<4x8xf32> to vector<4x1xf32>
    %289 = vector.extract_strided_slice %258 {offsets = [5, 0], sizes = [1, 256], strides = [1, 1]} : vector<8x256xf32> to vector<1x256xf32>
    %290 = vector.broadcast %288 : vector<4x1xf32> to vector<4x256xf32>
    %291 = vector.broadcast %289 : vector<1x256xf32> to vector<4x256xf32>
    %292 = arith.mulf %290, %291 : vector<4x256xf32>
    %293 = arith.addf %287, %292 : vector<4x256xf32>
    %294 = vector.extract_strided_slice %9 {offsets = [0, 6], sizes = [4, 1], strides = [1, 1]} : vector<4x8xf32> to vector<4x1xf32>
    %295 = vector.extract_strided_slice %258 {offsets = [6, 0], sizes = [1, 256], strides = [1, 1]} : vector<8x256xf32> to vector<1x256xf32>
    %296 = vector.broadcast %294 : vector<4x1xf32> to vector<4x256xf32>
    %297 = vector.broadcast %295 : vector<1x256xf32> to vector<4x256xf32>
    %298 = arith.mulf %296, %297 : vector<4x256xf32>
    %299 = arith.addf %293, %298 : vector<4x256xf32>
    %300 = vector.extract_strided_slice %9 {offsets = [0, 7], sizes = [4, 1], strides = [1, 1]} : vector<4x8xf32> to vector<4x1xf32>
    %301 = vector.extract_strided_slice %258 {offsets = [7, 0], sizes = [1, 256], strides = [1, 1]} : vector<8x256xf32> to vector<1x256xf32>
    %302 = vector.broadcast %300 : vector<4x1xf32> to vector<4x256xf32>
    %303 = vector.broadcast %301 : vector<1x256xf32> to vector<4x256xf32>
    %304 = arith.mulf %302, %303 : vector<4x256xf32>
    %305 = arith.addf %299, %304 : vector<4x256xf32>
    %306 = vector.broadcast %10 : vector<4x1xf32> to vector<4x256xf32>
    %307 = arith.addf %305, %306 : vector<4x256xf32>
    %308 = vector.extract_strided_slice %11 {offsets = [0, 256], sizes = [4, 256], strides = [1, 1]} : vector<4x512xf32> to vector<4x256xf32>
    %309 = arith.addf %307, %308 : vector<4x256xf32>
    %c0_22 = arith.constant 0 : index
    %c256 = arith.constant 256 : index
    %310 = vector.load %arg4[%c0_22, %c256] : memref<4x512xf32, #tpu.memory_space<vmem>>, vector<4x256xf32>
    tpu.vector_store %arg4[%c0_22, %c256], %309 {strides = array<i32>} : memref<4x512xf32, #tpu.memory_space<vmem>>, vector<4x256xf32>,
    return
  }
  func.func @transform_0(%arg0: i32) -> (i32, i32) {
    %c0_i32 = arith.constant 0 : i32
    %c0_i32_0 = arith.constant 0 : i32
    return %c0_i32, %arg0 : i32, i32
  }
  func.func @transform_1(%arg0: i32) -> (i32, i32) {
    %c0_i32 = arith.constant 0 : i32
    %c0_i32_0 = arith.constant 0 : i32
    %c0_i32_1 = arith.constant 0 : i32
    return %c0_i32, %c0_i32_0 : i32, i32
  }
  func.func @transform_2(%arg0: i32) -> (i32, i32) {
    %c0_i32 = arith.constant 0 : i32
    %c0_i32_0 = arith.constant 0 : i32
    %c0_i32_1 = arith.constant 0 : i32
    return %c0_i32, %c0_i32_0 : i32, i32
  }
  func.func @transform_3(%arg0: i32) -> (i32, i32) {
    %c0_i32 = arith.constant 0 : i32
    %c0_i32_0 = arith.constant 0 : i32
    return %c0_i32, %arg0 : i32, i32
  }
}

</mosaic_0001>

<bundles_post_ra>
// kernel: block_forward_pallas.1
= control target key start
LH: loop header
LB: loop body
LE: loop exit
PB: predicated region body
PF: predicated region fallthrough
CT: control target
= control target key end

     0   :  { %v1212_v0 = vmov 0   ;;  %v1213_v2 = vmov 2   ;;  %v1214_v3 = vmov 1   ;;  %v1215_v4 = vmov 3   ;;  %s1227_s18 = smov 17   ;;  %s1228_s19 = smov 16   ;;  %s1836_s1 = inlined_call_operand.vmem [shape: f32[8,30], index: 1, kind: input, shape index: {}]   ;;  %s1837_s0 = inlined_call_operand.vmem [shape: f32[4,512], index: 0, kind: input, shape index: {}]   ;;  %s1838_s2 = inlined_call_operand.vmem [shape: f32[9,512], index: 2, kind: input, shape index: {}]   ;;  %s1839_s3 = inlined_call_operand.vmem [shape: f32[4,512], index: 3, kind: output, shape index: {}]  }
   0x1   :  { %1124 = vset.pattern.permute.xlu0 %v1212_v0  ;;  %v1271_v1 = vld [vmem:[%s1836_s1] sm:$0xff]  ;;  %1126 = vset.pattern.permute.xlu1 %v1213_v2  ;;  %v1216_v5 = vmov 4   ;;  %v1217_v6 = vmov 5   ;;  %v1218_v7 = vmov 8   ;;  %v1219_v8 = vmov 6   ;;  %v16_v22 = vld [vmem:[%s1837_s0 + $0x8] sm:$0xff] }
   0x2   :  { %1854 = vst [vmem:[#allocation2_spill] sm:$0xff] %v1271_v1  ;;  %19 = vperm.xlu0 %1124, %v1271_v1   ;;  %113 = vperm.xlu1 %1126, %v1271_v1   ;;  %v1220_v9 = vmov 9   ;;  %v1221_v10 = vmov 7   ;;  %v1222_v11 = vmov 11   ;;  %v1223_v12 = vmov 10   ;;  %v15_v21 = vld [vmem:[%s1837_s0] sm:$0xff] }
   0x3   :  { %v1224_v13 = vmov 12   ;;  %v1225_v14 = vmov 13   ;;  %v1226_v15 = vmov 14   ;;  %v24_v16 = vlaneseq  ;;  %s1229_s20 = smov 15   ;;  %s1230_s21 = smov 1  }
   0x4   :  { %s1231_s22 = smov 127   ;;  %s1232_s23 = smov 113   ;;  %vm664_vm8 = vcmask 130168   ;;  %vm697_vm9 = vcmask 138368  }
   0x5   :  { %v25_v17 = vshrl.u32 %v24_v16, 7  ;;  %s1233_s24 = smov 112   ;;  %s1234_s25 = smov 111  }
   0x6   :  { %1125 = vset.pattern.permute.xlu0 %v1214_v3  ;;  %1127 = vset.pattern.permute.xlu1 %v1215_v4  ;;  %s1236_s15 = smov 3  }
   0x7   :  { %65 = vperm.xlu0 %1125, %v1271_v1   ;;  %161 = vperm.xlu1 %1127, %v1271_v1   ;;  %v1288_v18 = vsub.s32 0, %v25_v17  ;;  %v1290_v19 = vsub.s32 4, %v25_v17  ;;  %v1292_v20 = vsub.s32 2, %v25_v17  ;;  %v1300_v23 = vsub.s32 6, %v25_v17 }
   0x8   :  { %v1302_v24 = vsub.s32 1, %v25_v17  ;;  %v1304_v25 = vsub.s32 5, %v25_v17  ;;  %v1306_v26 = vsub.s32 3, %v25_v17  ;;  %v1308_v27 = vsub.s32 7, %v25_v17 }
   0x9   :  { %1855 = vst [vmem:[#allocation3_spill] sm:$0xff] %v1288_v18  ;;  %1856 = vst [vmem:[#allocation4_spill] sm:$0xff] %v1290_v19  ;;  %v27_v28 = vrot.slane %v15_v21, %v1288_v18  ;;  %v31_v29 = vrot.slane %v15_v21, %v1290_v19  ;;  %v35_v30 = vrot.slane %v16_v22, %v1288_v18 }
   0xa   :  { %1857 = vst [vmem:[#allocation5_spill] sm:$0xff] %v1292_v20  ;;  %1858 = vst [vmem:[#allocation6_spill] sm:$0xff] %v1302_v24  ;;  %v39_v31 = vrot.slane %v16_v22, %v1290_v19  ;;  %v119_v32 = vrot.slane %v15_v21, %v1292_v20  ;;  %v123_v33 = vrot.slane %v15_v21, %v1300_v23 }
   0xb   :  { %1128 = vset.pattern.permute.xlu1 %v1216_v5  ;;  %1129 = vset.pattern.permute.xlu0 %v1217_v6  ;;  %1859 = vst [vmem:[#allocation7_spill] sm:$0xff] %v1306_v26  ;;  %v127_v34 = vrot.slane %v16_v22, %v1292_v20  ;;  %v131_v35 = vrot.slane %v16_v22, %v1300_v23 }
   0xc   :  { %209 = vperm.xlu1 %1128, %v1271_v1   ;;  %288 = vperm.xlu0 %1129, %v1271_v1   ;;  %v71_v36 = vrot.slane %v15_v21, %v1302_v24  ;;  %v75_v37 = vrot.slane %v15_v21, %v1304_v25  ;;  %v79_v38 = vrot.slane %v16_v22, %v1302_v24 }
   0xd   :  { %v83_v39 = vrot.slane %v16_v22, %v1304_v25  ;;  %v167_v40 = vrot.slane %v15_v21, %v1306_v26  ;;  %v171_v41 = vrot.slane %v15_v21, %v1308_v27  ;;  %v175_v42 = vrot.slane %v16_v22, %v1306_v26 }
   0xe   :  { %v179_v43 = vrot.slane %v16_v22, %v1308_v27  ;;  %v47_v45 = vrot.slane %v27_v28, %v1288_v18  ;;  %v51_v46 = vrot.slane %v31_v29, %v1288_v18  ;;  %v55_v47 = vrot.slane %v35_v30, %v1288_v18 }
   0xf   :  { %v59_v48 = vrot.slane %v39_v31, %v1288_v18  ;;  %v139_v50 = vrot.slane %v119_v32, %v1292_v20  ;;  %v143_v51 = vrot.slane %v123_v33, %v1292_v20  ;;  %v147_v52 = vrot.slane %v127_v34, %v1292_v20 }
  0x10   :  { %1132 = vset.pattern.permute.xlu0 %v1218_v7  ;;  %1130 = vset.pattern.permute.xlu1 %v1219_v8  ;;  %v151_v53 = vrot.slane %v131_v35, %v1292_v20  ;;  %v91_v54 = vrot.slane %v71_v36, %v1302_v24  ;;  %v95_v55 = vrot.slane %v75_v37, %v1302_v24 }
  0x11   :  { %419 = vperm.xlu0 %1132, %v1271_v1   ;;  %329 = vperm.xlu1 %1130, %v1271_v1   ;;  %v99_v56 = vrot.slane %v79_v38, %v1302_v24  ;;  %v103_v57 = vrot.slane %v83_v39, %v1302_v24  ;;  %v187_v58 = vrot.slane %v167_v40, %v1306_v26 }
  0x12   :  { %v191_v59 = vrot.slane %v171_v41, %v1306_v26  ;;  %v195_v60 = vrot.slane %v175_v42, %v1306_v26  ;;  %v199_v61 = vrot.slane %v179_v43, %v1306_v26 }
  0x15   :  { %1133 = vset.pattern.permute.xlu0 %v1220_v9  ;;  %1131 = vset.pattern.permute.xlu1 %v1221_v10 }
  0x16   :  { %431 = vperm.xlu0 %1133, %v1271_v1   ;;  %374 = vperm.xlu1 %1131, %v1271_v1  }
  0x1a   :  { %1135 = vset.pattern.permute.xlu1 %v1222_v11  ;;  %1134 = vset.pattern.permute.xlu0 %v1223_v12 }
  0x1b   :  { %521 = vperm.xlu1 %1135, %v1271_v1   ;;  %476 = vperm.xlu0 %1134, %v1271_v1  }
  0x1f   :  { %1136 = vset.pattern.permute.xlu1 %v1224_v13  ;;  %1137 = vset.pattern.permute.xlu0 %v1225_v14 }
  0x20   :  { %566 = vperm.xlu1 %1136, %v1271_v1   ;;  %611 = vperm.xlu0 %1137, %v1271_v1  }
  0x24   :  { %1138 = vset.pattern.permute.xlu0 %v1226_v15 }
  0x81   :  { %v20_v44 = vpop.permute.xlu0 %19  ;;  %v114_v49 = vpop.permute.xlu1 %113 }
  0x82   :  { %v60_v62 = vmul.f32 %v47_v45, %v20_v44  ;;  %v61_v63 = vmul.f32 %v51_v46, %v20_v44  ;;  %v62_v0 = vmul.f32 %v55_v47, %v20_v44  ;;  %v63_v2 = vmul.f32 %v59_v48, %v20_v44 }
  0x83   :  { %v152_v3 = vmul.f32 %v139_v50, %v114_v49  ;;  %v153_v4 = vmul.f32 %v143_v51, %v114_v49  ;;  %v154_v5 = vmul.f32 %v147_v52, %v114_v49  ;;  %v155_v6 = vmul.f32 %v151_v53, %v114_v49 }
  0x86   :  { %v66_v7 = vpop.permute.xlu0 %65  ;;  %v162_v8 = vpop.permute.xlu1 %161 }
  0x87   :  { %v104_v9 = vmul.f32 %v91_v54, %v66_v7  ;;  %v105_v10 = vmul.f32 %v95_v55, %v66_v7  ;;  %v106_v11 = vmul.f32 %v99_v56, %v66_v7  ;;  %v107_v12 = vmul.f32 %v103_v57, %v66_v7 }
  0x88   :  { %v200_v13 = vmul.f32 %v187_v58, %v162_v8  ;;  %v201_v14 = vmul.f32 %v191_v59, %v162_v8  ;;  %v202_v15 = vmul.f32 %v195_v60, %v162_v8  ;;  %v203_v17 = vmul.f32 %v199_v61, %v162_v8 }
  0x89   :  { %v108_v21 = vadd.f32 %v104_v9, %v60_v62  ;;  %v109_v22 = vadd.f32 %v105_v10, %v61_v63  ;;  %v110_v28 = vadd.f32 %v106_v11, %v62_v0  ;;  %v111_v29 = vadd.f32 %v107_v12, %v63_v2 }
  0x8b   :  { %v156_v30 = vadd.f32 %v152_v3, %v108_v21  ;;  %v157_v31 = vadd.f32 %v153_v4, %v109_v22  ;;  %v158_v32 = vadd.f32 %v154_v5, %v110_v28  ;;  %v159_v33 = vadd.f32 %v155_v6, %v111_v29  ;;  %v210_v34 = vpop.permute.xlu1 %209  ;;  %v1391_v63 = vpop.permute.xlu0 %288 }
  0x8d   :  { %v204_v35 = vadd.f32 %v200_v13, %v156_v30  ;;  %v205_v36 = vadd.f32 %v201_v14, %v157_v31  ;;  %v206_v37 = vadd.f32 %v202_v15, %v158_v32  ;;  %v207_v38 = vadd.f32 %v203_v17, %v159_v33  ;;  %v1429_v33 = vld [vmem:[%s1838_s2 + $0x8] sm:$0xff] }
  0x8e   :  { %v1424_v32 = vand.u32 127, %v24_v16  ;;  %v1448_v16 = vld [vmem:[%s1838_s2 + $0x18] sm:$0xff] }
  0x8f   :  { %v212_v39 = vadd.f32 %v210_v34, %v204_v35  ;;  %v213_v40 = vadd.f32 %v210_v34, %v205_v36  ;;  %v214_v41 = vadd.f32 %v210_v34, %v206_v37  ;;  %v215_v42 = vadd.f32 %v210_v34, %v207_v38  ;;  %v1434_v34 = vld [vmem:[%s1838_s2] sm:$0xff]  ;;  %v1443_v37 = vld [vmem:[%s1838_s2 + $0x10] sm:$0xff] }
  0x90   :  { %v1393_v0 = vpop.permute.xlu1 %329  ;;  %v1395_v2 = vpop.permute.xlu0 %419  ;;  %vm262_vm0 = vcmp.lt.s32.totalorder %v1424_v32, 17  ;;  %v274_v38 = vrot.slane %v1429_v33, %v1288_v18  ;;  %vm303_vm1 = vcmp.lt.s32.totalorder %v1424_v32, 16  ;;  %vm348_vm2 = vcmp.lt.s32.totalorder %v1424_v32, 15 }
  0x91   :  { %v1070_v43 = vmul.f32 -1.442695, %v212_v39  ;;  %v1071_v44 = vmul.f32 -1.442695, %v213_v40  ;;  %v1072_v45 = vmul.f32 -1.442695, %v214_v41 }
  0x92   :  { %v1073_v46 = vmul.f32 -1.442695, %v215_v42  ;;  %vm393_vm3 = vcmp.lt.s32.totalorder %v1424_v32, 1  ;;  %vm450_vm4 = vcmp.lt.s32.totalorder %v1424_v32, 127  ;;  %vm495_vm5 = vcmp.lt.s32.totalorder %v1424_v32, 113 }
  0x93   :  { %1153 = vpow2.f32 %v1070_v43  ;;  %vm540_vm6 = vcmp.lt.s32.totalorder %v1424_v32, 112  ;;  %vm585_vm7 = vcmp.lt.s32.totalorder %v1424_v32, 111 }
  0x94   :  { %1155 = vpow2.f32 %v1071_v44 }
  0x95   :  { %1157 = vpow2.f32 %v1072_v45  ;;  %v1397_v3 = vpop.permute.xlu1 %374  ;;  %v432_v4 = vpop.permute.xlu0 %431 }
  0x96   :  { %1159 = vpow2.f32 %v1073_v46  ;;  %v311_v46 = vrot.slane %v1434_v34, %v1302_v24 }
  0x9a   :  { %v1399_v5 = vpop.permute.xlu0 %476  ;;  %v1401_v6 = vpop.permute.xlu1 %521 }
  0x9d   :  { %v1154_v47 = vpop.eup %1153 }
  0x9e   :  { %v1156_v48 = vpop.eup %1155  ;;  %v228_v49 = vadd.f32 1.0, %v1154_v47  ;;  %v319_v47 = vrot.slane %v1443_v37, %v1302_v24 }
  0x9f   :  { %v1158_v50 = vpop.eup %1157  ;;  %v229_v51 = vadd.f32 1.0, %v1156_v48  ;;  %v1403_v7 = vpop.permute.xlu0 %611 }
  0xa0   :  { %v1160_v52 = vpop.eup %1159  ;;  %v230_v53 = vadd.f32 1.0, %v1158_v50  ;;  %1161 = vrcp.f32 %v228_v49  ;;  %1860 = vst [vmem:[#allocation8_spill] sm:$0xff] %v1403_v7  ;;  %v1405_v8 = vpop.permute.xlu1 %566  ;;  %v323_v50 = vrot.slane %v1448_v16, %v1302_v24 }
  0xa1   :  { %v231_v54 = vadd.f32 1.0, %v1160_v52  ;;  %1163 = vrcp.f32 %v229_v51  ;;  %1861 = vst [vmem:[#allocation9_spill] sm:$0xff] %v1405_v8  ;;  %v360_v52 = vrot.slane %v1429_v33, %v1292_v20 }
  0xa2   :  { %1165 = vrcp.f32 %v230_v53  ;;  %v364_v53 = vrot.slane %v1443_v37, %v1292_v20 }
  0xa3   :  { %1167 = vrcp.f32 %v231_v54  ;;  %v356_v54 = vrot.slane %v1434_v34, %v1292_v20 }
  0xaa   :  { %v1162_v55 = vpop.eup %1161 }
  0xab   :  { %v1164_v56 = vpop.eup %1163  ;;  %v1342_v57 = vmul.f32 %v1162_v55, %v212_v39  ;;  %v270_v39 = vrot.slane %v1434_v34, %v1288_v18  ;;  %v368_v55 = vrot.slane %v1448_v16, %v1292_v20 }
  0xac   :  { %v1166_v58 = vpop.eup %1165  ;;  %v1344_v59 = vmul.f32 %v1164_v56, %v213_v40  ;;  %v278_v40 = vrot.slane %v1443_v37, %v1288_v18  ;;  %v405_v56 = vrot.slane %v1429_v33, %v1306_v26 }
  0xad   :  { %v1168_v60 = vpop.eup %1167  ;;  %252 = vrot.lane.b32.xlu0 %v1342_v57, %s1227_s18  ;;  %v1348_v61 = vmul.f32 %v1166_v58, %v214_v41  ;;  %v282_v41 = vrot.slane %v1448_v16, %v1288_v18  ;;  %v1465_v44 = vmul.f32 %v432_v4, %v1342_v57  ;;  %v401_v58 = vrot.slane %v1434_v34, %v1306_v26 }
  0xae   :  { %254 = vrot.lane.b32.xlu1 %v1344_v59, %s1227_s18  ;;  %v1350_v62 = vmul.f32 %v1168_v60, %v215_v42  ;;  %v315_v42 = vrot.slane %v1429_v33, %v1302_v24  ;;  %v1468_v45 = vmul.f32 %v432_v4, %v1344_v59  ;;  %v413_v60 = vrot.slane %v1448_v16, %v1306_v26 }
  0xaf   :  { %v1475_v48 = vmul.f32 %v432_v4, %v1348_v61 }
  0xb0   :  { %v1478_v49 = vmul.f32 %v432_v4, %v1350_v62 }
  0xb1   :  { %256 = vrot.lane.b32.xlu0 %v1348_v61, %s1227_s18 }
  0xb2   :  { %258 = vrot.lane.b32.xlu1 %v1350_v62, %s1227_s18  ;;  %s1237_s18 = smov 2  }
  0xb5   :  { %295 = vrot.lane.b32.xlu0 %v1342_v57, %s1228_s19 }
  0xb6   :  { %297 = vrot.lane.b32.xlu1 %v1344_v59, %s1228_s19 }
  0xb9   :  { %299 = vrot.lane.b32.xlu0 %v1348_v61, %s1228_s19 }
  0xba   :  { %301 = vrot.lane.b32.xlu1 %v1350_v62, %s1228_s19 }
  0xbd   :  { %344 = vrot.lane.b32.xlu0 %v1348_v61, %s1229_s20 }
  0xbe   :  { %340 = vrot.lane.b32.xlu1 %v1342_v57, %s1229_s20 }
  0xc1   :  { %389 = vrot.lane.b32.xlu0 %v1348_v61, %s1230_s21 }
  0xc2   :  { %342 = vrot.lane.b32.xlu1 %v1344_v59, %s1229_s20 }
  0xc5   :  { %444 = vrot.lane.b32.xlu0 %v1344_v59, %s1231_s22 }
  0xc6   :  { %346 = vrot.lane.b32.xlu1 %v1350_v62, %s1229_s20 }
  0xc9   :  { %448 = vrot.lane.b32.xlu0 %v1350_v62, %s1231_s22 }
  0xca   :  { %385 = vrot.lane.b32.xlu1 %v1342_v57, %s1230_s21 }
  0xcd   :  { %487 = vrot.lane.b32.xlu0 %v1342_v57, %s1232_s23 }
  0xce   :  { %387 = vrot.lane.b32.xlu1 %v1344_v59, %s1230_s21 }
  0xd1   :  { %491 = vrot.lane.b32.xlu0 %v1348_v61, %s1232_s23 }
  0xd2   :  { %391 = vrot.lane.b32.xlu1 %v1350_v62, %s1230_s21 }
  0xd5   :  { %536 = vrot.lane.b32.xlu0 %v1348_v61, %s1233_s24 }
  0xd6   :  { %442 = vrot.lane.b32.xlu1 %v1342_v57, %s1231_s22 }
  0xd9   :  { %577 = vrot.lane.b32.xlu0 %v1342_v57, %s1234_s25 }
  0xda   :  { %446 = vrot.lane.b32.xlu1 %v1348_v61, %s1231_s22 }
  0xdd   :  { %581 = vrot.lane.b32.xlu0 %v1348_v61, %s1234_s25 }
  0xde   :  { %489 = vrot.lane.b32.xlu1 %v1344_v59, %s1232_s23 }
  0xe1   :  { %623 = vperm.xlu0 %1138, %v1271_v1  }
  0xe2   :  { %493 = vrot.lane.b32.xlu1 %v1350_v62, %s1232_s23 }
  0xe6   :  { %532 = vrot.lane.b32.xlu1 %v1342_v57, %s1233_s24  ;;  %v409_v57 = vrot.slane %v1443_v37, %v1306_v26 }
  0xea   :  { %534 = vrot.lane.b32.xlu1 %v1344_v59, %s1233_s24 }
  0xee   :  { %538 = vrot.lane.b32.xlu1 %v1350_v62, %s1233_s24 }
  0xf2   :  { %579 = vrot.lane.b32.xlu1 %v1344_v59, %s1234_s25 }
  0xf6   :  { %583 = vrot.lane.b32.xlu1 %v1350_v62, %s1234_s25 }
 0x11f   :  { %v253_v9 = vpop.permute.xlu0 %252 }
 0x120   :  { %v1407_v10 = vpop.permute.xlu1 %254 }
 0x121   :  { %v265_v61 = vsel %vm262_vm0, %v253_v9, %v1407_v10 }
 0x123   :  { %v1409_v11 = vpop.permute.xlu0 %256 }
 0x124   :  { %v1411_v12 = vpop.permute.xlu1 %258 }
 0x125   :  { %v266_v62 = vsel %vm262_vm0, %v1411_v12, %v253_v9  ;;  %v548_v9 = vrot.slane %v1434_v34, %v1308_v27  ;;  %v263_v7 = vsel %vm262_vm0, %v1409_v11, %v1411_v12 }
 0x127   :  { %v296_v14 = vpop.permute.xlu0 %295 }
 0x128   :  { %v298_v13 = vpop.permute.xlu1 %297 }
 0x129   :  { %v306_v20 = vsel %vm303_vm1, %v296_v14, %v298_v13 }
 0x12a   :  { %v325_v4 = vmul.f32 %v315_v42, %v306_v20 }
 0x12b   :  { %v300_v17 = vpop.permute.xlu0 %299 }
 0x12c   :  { %v302_v15 = vpop.permute.xlu1 %301  ;;  %v305_v26 = vsel %vm303_vm1, %v298_v13, %v300_v17 }
 0x12d   :  { %v307_v19 = vsel %vm303_vm1, %v302_v15, %v296_v14  ;;  %v304_v24 = vsel %vm303_vm1, %v300_v17, %v302_v15  ;;  %v284_v15 = vmul.f32 %v274_v38, %v265_v61  ;;  %v283_v17 = vmul.f32 %v270_v39, %v266_v62 }
 0x12e   :  { %v324_v8 = vmul.f32 %v311_v46, %v307_v19  ;;  %v264_v19 = vsel %vm262_vm0, %v1407_v10, %v1409_v11  ;;  %v326_v20 = vmul.f32 %v319_v47, %v305_v26  ;;  %v327_v42 = vmul.f32 %v323_v50, %v304_v24 }
 0x12f   :  { %v1413_v22 = vpop.permute.xlu0 %344  ;;  %v285_v11 = vmul.f32 %v278_v40, %v264_v19  ;;  %v333_v46 = vmul.f32 %v1393_v0, %v325_v4  ;;  %v291_v40 = vmul.f32 %v1391_v63, %v283_v17  ;;  %v552_v17 = vrot.slane %v1429_v33, %v1308_v27 }
 0x130   :  { %v341_v21 = vpop.permute.xlu1 %340  ;;  %v556_v19 = vrot.slane %v1443_v37, %v1308_v27 }
 0x133   :  { %v1419_v30 = vpop.permute.xlu0 %389 }
 0x134   :  { %v1415_v28 = vpop.permute.xlu1 %342 }
 0x135   :  { %v351_v14 = vsel %vm348_vm2, %v341_v21, %v1415_v28 }
 0x136   :  { %v370_v12 = vmul.f32 %v360_v52, %v351_v14 }
 0x137   :  { %v1436_v35 = vpop.permute.xlu0 %444 }
 0x138   :  { %v1417_v29 = vpop.permute.xlu1 %346 }
 0x139   :  { %v352_v13 = vsel %vm348_vm2, %v1417_v29, %v341_v21  ;;  %v350_v21 = vsel %vm348_vm2, %v1415_v28, %v1413_v22  ;;  %v349_v38 = vsel %vm348_vm2, %v1413_v22, %v1417_v29  ;;  %v286_v28 = vmul.f32 %v282_v41, %v263_v7 }
 0x13a   :  { %v369_v39 = vmul.f32 %v356_v54, %v352_v13  ;;  %v332_v22 = vmul.f32 %v1393_v0, %v324_v8  ;;  %v371_v29 = vmul.f32 %v364_v53, %v350_v21  ;;  %v372_v47 = vmul.f32 %v368_v55, %v349_v38 }
 0x13b   :  { %v1483_v51 = vpop.permute.xlu0 %448  ;;  %v292_v7 = vmul.f32 %v1391_v63, %v284_v15  ;;  %v334_v53 = vmul.f32 %v1393_v0, %v326_v20  ;;  %v335_v54 = vmul.f32 %v1393_v0, %v327_v42 }
 0x13c   :  { %v1421_v31 = vpop.permute.xlu1 %385  ;;  %v377_v55 = vmul.f32 %v1397_v3, %v369_v39  ;;  %v336_v13 = vadd.f32 %v332_v22, %v291_v40 }
 0x13d   :  { %v337_v14 = vadd.f32 %v333_v46, %v292_v7 }
 0x13f   :  { %v1532_v18 = vpop.permute.xlu0 %487 }
 0x140   :  { %v1438_v36 = vpop.permute.xlu1 %387 }
 0x141   :  { %v396_v10 = vsel %vm393_vm3, %v1421_v31, %v1438_v36  ;;  %v395_v50 = vsel %vm393_vm3, %v1438_v36, %v1419_v30  ;;  %v378_v36 = vmul.f32 %v1397_v3, %v370_v12 }
 0x142   :  { %v415_v8 = vmul.f32 %v405_v56, %v396_v10  ;;  %v416_v62 = vmul.f32 %v409_v57, %v395_v50  ;;  %v379_v56 = vmul.f32 %v1397_v3, %v371_v29  ;;  %v1862_v29 = vrot.slane %v1434_v34, %v1304_v25 }
 0x143   :  { %v492_v52 = vpop.permute.xlu0 %491  ;;  %v382_v57 = vadd.f32 %v378_v36, %v337_v14 }
 0x144   :  { %v1462_v43 = vpop.permute.xlu1 %391  ;;  %v423_v15 = vmul.f32 %v1395_v2, %v415_v8  ;;  %v424_v38 = vmul.f32 %v1395_v2, %v416_v62  ;;  %v1866_v62 = vrot.slane %v1448_v16, %v1304_v25 }
 0x145   :  { %v397_v24 = vsel %vm393_vm3, %v1462_v43, %v1421_v31  ;;  %v394_v31 = vsel %vm393_vm3, %v1419_v30, %v1462_v43  ;;  %v293_v30 = vmul.f32 %v1391_v63, %v285_v11  ;;  %v294_v43 = vmul.f32 %v1391_v63, %v286_v28 }
 0x146   :  { %v414_v41 = vmul.f32 %v401_v58, %v397_v24  ;;  %v417_v4 = vmul.f32 %v413_v60, %v394_v31  ;;  %v380_v58 = vmul.f32 %v1397_v3, %v372_v47  ;;  %v381_v60 = vadd.f32 %v377_v55, %v336_v13 }
 0x147   :  { %v338_v20 = vadd.f32 %v334_v53, %v293_v30  ;;  %v339_v63 = vadd.f32 %v335_v54, %v294_v43  ;;  %v537_v42 = vpop.permute.xlu0 %536  ;;  %v560_v11 = vrot.slane %v1448_v16, %v1308_v27  ;;  %v427_v28 = vadd.f32 %v423_v15, %v382_v57 }
 0x148   :  { %v1500_v59 = vpop.permute.xlu1 %442  ;;  %v422_v0 = vmul.f32 %v1395_v2, %v414_v41  ;;  %v425_v3 = vmul.f32 %v1395_v2, %v417_v4  ;;  %v1863_v31 = vrot.slane %v1429_v33, %v1304_v25  ;;  %v1864_v54 = vrot.slane %v1434_v34, %v1300_v23 }
 0x149   :  { %v453_v12 = vsel %vm450_vm4, %v1500_v59, %v1436_v35  ;;  %v383_v10 = vadd.f32 %v379_v56, %v338_v20  ;;  %v384_v24 = vadd.f32 %v380_v58, %v339_v63  ;;  %v439_v14 = vadd.f32 %v1468_v45, %v427_v28 }
 0x14a   :  { %v426_v46 = vadd.f32 %v422_v0, %v381_v60  ;;  %v471_v47 = vmul.f32 %v1862_v29, %v453_v12  ;;  %v1867_v13 = vrot.slane %v1443_v37, %v1304_v25  ;;  %v1868_v58 = vrot.slane %v1443_v37, %v1300_v23  ;;  %v1870_v12 = vld [vmem:[#allocation9_spill] sm:$0xff] }
 0x14b   :  { %v429_v8 = vadd.f32 %v425_v3, %v384_v24  ;;  %v578_v53 = vpop.permute.xlu0 %577  ;;  %v1869_v45 = vrot.slane %v1448_v16, %v1300_v23 }
 0x14c   :  { %v1534_v1 = vpop.permute.xlu1 %446  ;;  %v438_v43 = vadd.f32 %v1465_v44, %v426_v46  ;;  %v479_v56 = vmul.f32 %v1399_v5, %v471_v47 }
 0x14d   :  { %v452_v39 = vsel %vm450_vm4, %v1436_v35, %v1534_v1  ;;  %v454_v35 = vsel %vm450_vm4, %v1483_v51, %v1500_v59  ;;  %v451_v50 = vsel %vm450_vm4, %v1534_v1, %v1483_v51  ;;  %v1865_v1 = vrot.slane %v1429_v33, %v1300_v23 }
 0x14e   :  { %v472_v7 = vmul.f32 %v1863_v31, %v452_v39  ;;  %v474_v4 = vmul.f32 %v1866_v62, %v454_v35  ;;  %v473_v33 = vmul.f32 %v1867_v13, %v451_v50  ;;  %v441_v57 = vadd.f32 %v1478_v49, %v429_v8  ;;  %v1075_v49 = vld [vmem:[%s1838_s2 + $0x28] ss:$0 sm:$0xff]  ;;  %v1871_v8 = vld [vmem:[#allocation8_spill] sm:$0xff] }
 0x14f   :  { %v582_v3 = vpop.permute.xlu0 %581 }
 0x150   :  { %v490_v26 = vpop.permute.xlu1 %489  ;;  %v482_v37 = vmul.f32 %v1399_v5, %v474_v4  ;;  %v481_v60 = vmul.f32 %v1399_v5, %v473_v33 }
 0x151   :  { %v497_v2 = vsel %vm495_vm5, %v490_v26, %v492_v52  ;;  %v498_v22 = vsel %vm495_vm5, %v1532_v18, %v490_v26  ;;  %v428_v26 = vadd.f32 %v424_v38, %v383_v10 }
 0x152   :  { %v516_v36 = vmul.f32 %v1864_v54, %v498_v22  ;;  %v517_v51 = vmul.f32 %v1865_v1, %v497_v2  ;;  %v486_v29 = vadd.f32 %v482_v37, %v441_v57 }
 0x153   :  { %v440_v34 = vadd.f32 %v1475_v48, %v428_v26 }
 0x154   :  { %v494_v61 = vpop.permute.xlu1 %493 }
 0x155   :  { %v496_v55 = vsel %vm495_vm5, %v492_v52, %v494_v61  ;;  %v499_v30 = vsel %vm495_vm5, %v494_v61, %v1532_v18  ;;  %v480_v52 = vmul.f32 %v1399_v5, %v472_v7  ;;  %v485_v47 = vadd.f32 %v481_v60, %v440_v34  ;;  %v1077_v7 = vld [vmem:[%s1838_s2 + $0x38] ss:$0 sm:$0xff] }
 0x156   :  { %v518_v15 = vmul.f32 %v1868_v58, %v496_v55  ;;  %v519_v0 = vmul.f32 %v1869_v45, %v499_v30 }
 0x157   :  { %v484_v48 = vadd.f32 %v480_v52, %v439_v14 }
 0x158   :  { %v533_v21 = vpop.permute.xlu1 %532  ;;  %v526_v5 = vmul.f32 %v1401_v6, %v518_v15 }
 0x15c   :  { %v535_v40 = vpop.permute.xlu1 %534 }
 0x15d   :  { %v542_v41 = vsel %vm540_vm6, %v535_v40, %v537_v42  ;;  %v543_v59 = vsel %vm540_vm6, %v533_v21, %v535_v40 }
 0x15e   :  { %v561_v18 = vmul.f32 %v548_v9, %v543_v59  ;;  %v562_v61 = vmul.f32 %v552_v17, %v542_v41  ;;  %v524_v9 = vmul.f32 %v1401_v6, %v516_v36  ;;  %v525_v17 = vmul.f32 %v1401_v6, %v517_v51 }
 0x15f   :  { %v530_v36 = vadd.f32 %v526_v5, %v485_v47  ;;  %v1872_v5 = vld [vmem:[#allocation2_spill] sm:$0xff] }
 0x160   :  { %v539_v44 = vpop.permute.xlu1 %538  ;;  %v569_v39 = vmul.f32 %v1870_v12, %v561_v18  ;;  %v570_v10 = vmul.f32 %v1870_v12, %v562_v61  ;;  %v529_v2 = vadd.f32 %v525_v17, %v484_v48  ;;  %v624_v30 = vpop.permute.xlu0 %623 }
 0x161   :  { %v541_v20 = vsel %vm540_vm6, %v537_v42, %v539_v44  ;;  %v544_v63 = vsel %vm540_vm6, %v539_v44, %v533_v21  ;;  %v1074_v42 = vld [vmem:[%s1838_s2 + $0x20] ss:$0 sm:$0xff]  ;;  %v483_v21 = vadd.f32 %v479_v56, %v438_v43 }
 0x162   :  { %v563_v16 = vmul.f32 %v556_v19, %v541_v20  ;;  %v564_v38 = vmul.f32 %v560_v11, %v544_v63  ;;  %v527_v19 = vmul.f32 %v1401_v6, %v519_v0  ;;  %v1076_v6 = vld [vmem:[%s1838_s2 + $0x30] ss:$0 sm:$0xff]  ;;  %v574_v26 = vadd.f32 %v570_v10, %v529_v2  ;;  %s1235_s2 = smov 126  }
 0x163   :  { %v528_v46 = vadd.f32 %v524_v9, %v483_v21 }
 0x164   :  { %v580_v24 = vpop.permute.xlu1 %579  ;;  %v571_v50 = vmul.f32 %v1870_v12, %v563_v16  ;;  %v572_v31 = vmul.f32 %v1870_v12, %v564_v38  ;;  %v531_v1 = vadd.f32 %v527_v19, %v486_v29  ;;  %v705_v19 = vrot.slane %v1872_v5, 1 }
 0x165   :  { %v587_v11 = vsel %vm585_vm7, %v580_v24, %v582_v3  ;;  %v588_v28 = vsel %vm585_vm7, %v578_v53, %v580_v24  ;;  %v573_v40 = vadd.f32 %v569_v39, %v528_v46 }
 0x166   :  { %v606_v22 = vmul.f32 %v1074_v42, %v588_v28  ;;  %v607_v35 = vmul.f32 %v1075_v49, %v587_v11  ;;  %v575_v13 = vadd.f32 %v571_v50, %v530_v36  ;;  %v576_v33 = vadd.f32 %v572_v31, %v531_v1 }
 0x168   :  { %v614_v41 = vmul.f32 %v1871_v8, %v606_v22  ;;  %v615_v59 = vmul.f32 %v1871_v8, %v607_v35  ;;  %v584_v54 = vpop.permute.xlu1 %583 }
 0x169   :  { %v586_v51 = vsel %vm585_vm7, %v582_v3, %v584_v54  ;;  %v589_v55 = vsel %vm585_vm7, %v584_v54, %v578_v53 }
 0x16a   :  { %v618_v43 = vadd.f32 %v614_v41, %v573_v40  ;;  %v619_v62 = vadd.f32 %v615_v59, %v574_v26  ;;  %v608_v4 = vmul.f32 %v1076_v6, %v586_v51  ;;  %v609_v14 = vmul.f32 %v1077_v7, %v589_v55 }
 0x16c   :  { %v616_v56 = vmul.f32 %v1871_v8, %v608_v4  ;;  %v617_v52 = vmul.f32 %v1871_v8, %v609_v14  ;;  %v626_v18 = vadd.f32 %v624_v30, %v618_v43  ;;  %v627_v61 = vadd.f32 %v624_v30, %v619_v62 }
 0x16e   :  { %v620_v44 = vadd.f32 %v616_v56, %v575_v13  ;;  %v621_v58 = vadd.f32 %v617_v52, %v576_v33  ;;  %v1078_v15 = vmul.f32 -1.442695, %v626_v18  ;;  %v1079_v45 = vmul.f32 -1.442695, %v627_v61 }
 0x170   :  { %1169 = vpow2.f32 %v1078_v15  ;;  %v628_v32 = vadd.f32 %v624_v30, %v620_v44  ;;  %v629_v53 = vadd.f32 %v624_v30, %v621_v58 }
 0x171   :  { %1171 = vpow2.f32 %v1079_v45 }
 0x172   :  { %v1080_v0 = vmul.f32 -1.442695, %v628_v32  ;;  %v1081_v20 = vmul.f32 -1.442695, %v629_v53 }
 0x174   :  { %1173 = vpow2.f32 %v1080_v0 }
 0x175   :  { %1175 = vpow2.f32 %v1081_v20 }
 0x17a   :  { %v1170_v63 = vpop.eup %1169 }
 0x17b   :  { %v1172_v57 = vpop.eup %1171  ;;  %v642_v34 = vadd.f32 1.0, %v1170_v63 }
 0x17c   :  { %v643_v9 = vadd.f32 1.0, %v1172_v57 }
 0x17d   :  { %1177 = vrcp.f32 %v642_v34 }
 0x17e   :  { %v1174_v17 = vpop.eup %1173  ;;  %1179 = vrcp.f32 %v643_v9 }
 0x17f   :  { %v1176_v37 = vpop.eup %1175  ;;  %v644_v60 = vadd.f32 1.0, %v1174_v17 }
 0x180   :  { %v645_v16 = vadd.f32 1.0, %v1176_v37 }
 0x181   :  { %1181 = vrcp.f32 %v644_v60 }
 0x182   :  { %1183 = vrcp.f32 %v645_v16 }
 0x187   :  { %v1178_v38 = vpop.eup %1177 }
 0x188   :  { %v1180_v42 = vpop.eup %1179  ;;  %v1705_v49 = vmul.f32 %v1178_v38, %v626_v18 }
 0x189   :  { %v1707_v21 = vmul.f32 %v1180_v42, %v627_v61 }
 0x18b   :  { %v1182_v48 = vpop.eup %1181  ;;  %v658_v3 = vadd.f32 %v1707_v21, %v1705_v49 }
 0x18c   :  { %v1184_v12 = vpop.eup %1183  ;;  %v1711_v39 = vmul.f32 %v1182_v48, %v628_v32 }
 0x18d   :  { %659 = vadd.xlane.f32.xlu1 %v658_v3  ;;  %v1713_v10 = vmul.f32 %v1184_v12, %v629_v53 }
 0x18f   :  { %v885_v24 = vadd.f32 %v1713_v10, %v1711_v39 }
 0x191   :  { %886 = vadd.xlane.f32.xlu0 %v885_v24 }
 0x19e   :  { %672 = vrot.lane.b32.xlu1 %v1872_v5, %s1235_s2 }
 0x1a7   :  { %706 = vrot.lane.b32.xlu0 %v705_v19, %s1231_s22  ;;  %v1873_v19 = vld [vmem:[#allocation3_spill] sm:$0xff] }
 0x21a   :  { %v660_v11 = vpop.xlane.xlu1 %659 }
 0x21b   :  { %v662_v28 = vmul.f32 0.00390625, %v660_v11 }
 0x21d   :  { %v663_v46 = vmul.f32 %v662_v28, %v1872_v5 }
 0x21e   :  { %v887_v2 = vpop.xlane.xlu0 %886  ;;  %v673_v13 = vpop.permute.xlu1 %672 }
 0x21f   :  { %v665_v22 = vsel %vm664_vm8, %v663_v46, 0.0  ;;  %v698_v35 = vsel %vm697_vm9, %v663_v46, 0.0  ;;  %v888_v29 = vmul.f32 0.00390625, %v887_v2 }
 0x220   :  { %v666_v47 = vrot.slane %v665_v22, 4  ;;  %v699_v50 = vrot.slane %v698_v35, 4 }
 0x221   :  { %v889_v31 = vmul.f32 %v888_v29, %v1872_v5 }
 0x222   :  { %v667_v6 = vadd.f32 %v666_v47, %v665_v22  ;;  %v700_v7 = vadd.f32 %v699_v50, %v698_v35  ;;  %v707_v14 = vpop.permute.xlu0 %706 }
 0x223   :  { %v890_v40 = vsel %vm664_vm8, %v889_v31, 0.0  ;;  %v919_v26 = vsel %vm697_vm9, %v889_v31, 0.0  ;;  %v1729_v31 = vld [vmem:[%s1836_s1] sm:$0xff] }
 0x224   :  { %v668_v8 = vrot.slane %v667_v6, 2  ;;  %v701_v41 = vrot.slane %v700_v7, 2  ;;  %v891_v59 = vrot.slane %v890_v40, 4  ;;  %v920_v54 = vrot.slane %v919_v26, 4 }
 0x226   :  { %v892_v36 = vadd.f32 %v891_v59, %v890_v40  ;;  %v921_v1 = vadd.f32 %v920_v54, %v919_v26  ;;  %v702_v51 = vadd.f32 %v701_v41, %v700_v7  ;;  %v669_v55 = vadd.f32 %v668_v8, %v667_v6 }
 0x227   :  { %v1238_v54 = vmov 22  }
 0x228   :  { %v893_v30 = vrot.slane %v892_v36, 2  ;;  %v922_v43 = vrot.slane %v921_v1, 2  ;;  %v703_v62 = vrot.slane %v702_v51, 1  ;;  %v670_v4 = vrot.slane %v669_v55, 1  ;;  %1140 = vset.pattern.permute.xlu0 %v1238_v54 }
 0x22a   :  { %v923_v33 = vadd.f32 %v922_v43, %v921_v1  ;;  %v704_v56 = vadd.f32 %v703_v62, %v702_v51  ;;  %v671_v52 = vadd.f32 %v670_v4, %v669_v55  ;;  %v894_v18 = vadd.f32 %v893_v30, %v892_v36 }
 0x22b   :  { %v1239_v36 = vmov 21   ;;  %v1240_v1 = vmov 20  }
 0x22c   :  { %v924_v61 = vrot.slane %v923_v33, 1  ;;  %v709_v44 = vadd.f32 %v707_v14, %v704_v56  ;;  %v895_v58 = vrot.slane %v894_v18, 1  ;;  %v675_v15 = vadd.f32 %v673_v13, %v671_v52  ;;  %1139 = vset.pattern.permute.xlu1 %v1239_v36 }
 0x22e   :  { %v925_v45 = vadd.f32 %v924_v61, %v923_v33  ;;  %v1083_v32 = vmul.f32 -1.442695, %v709_v44  ;;  %v896_v53 = vadd.f32 %v895_v58, %v894_v18  ;;  %v1082_v0 = vmul.f32 -1.442695, %v675_v15 }
 0x230   :  { %1185 = vpow2.f32 %v1083_v32  ;;  %v926_v20 = vadd.f32 %v925_v45, %v707_v14  ;;  %v897_v63 = vadd.f32 %v896_v53, %v673_v13  ;;  %v1241_v45 = vmov 25  }
 0x231   :  { %1187 = vpow2.f32 %v1082_v0  ;;  %v1242_v32 = vmov 23   ;;  %v1243_v53 = vmov 28   ;;  %v1244_v0 = vmov 24  }
 0x232   :  { %v1086_v57 = vmul.f32 -1.442695, %v926_v20  ;;  %v1085_v34 = vmul.f32 -1.442695, %v897_v63 }
 0x234   :  { %1189 = vpow2.f32 %v1086_v57  ;;  %v1247_v57 = vmov 29  }
 0x235   :  { %1191 = vpow2.f32 %v1085_v34 }
 0x23a   :  { %v1186_v9 = vpop.eup %1185 }
 0x23b   :  { %v1188_v17 = vpop.eup %1187  ;;  %v713_v37 = vadd.f32 1.0, %v1186_v9 }
 0x23c   :  { %v679_v60 = vadd.f32 1.0, %v1188_v17 }
 0x23d   :  { %1193 = vrcp.f32 %v713_v37 }
 0x23e   :  { %v1190_v16 = vpop.eup %1189  ;;  %1195 = vrcp.f32 %v679_v60 }
 0x23f   :  { %v1192_v38 = vpop.eup %1191  ;;  %v930_v42 = vadd.f32 1.0, %v1190_v16 }
 0x240   :  { %v901_v48 = vadd.f32 1.0, %v1192_v38 }
 0x241   :  { %1197 = vrcp.f32 %v930_v42 }
 0x242   :  { %1199 = vrcp.f32 %v901_v48  ;;  %v1874_v48 = vld [vmem:[#allocation6_spill] sm:$0xff] }
 0x247   :  { %v1194_v3 = vpop.eup %1193 }
 0x248   :  { %v1196_v12 = vpop.eup %1195  ;;  %v716_v24 = vmul.f32 %v1194_v3, %v709_v44 }
 0x249   :  { %v682_v5 = vmul.f32 %v1196_v12, %v675_v15 }
 0x24a   :  { %v720_v11 = vrot.slane %v716_v24, %v1873_v19 }
 0x24b   :  { %v1198_v28 = vpop.eup %1197  ;;  %v686_v46 = vrot.slane %v682_v5, %v1873_v19 }
 0x24c   :  { %v1200_v2 = vpop.eup %1199  ;;  %722 = vrot.lane.b32.xlu0 %v720_v11, %s1236_s15  ;;  %v933_v35 = vmul.f32 %v1198_v28, %v926_v20  ;;  %v1245_v20 = vmov 26   ;;  %v1876_v28 = vld [vmem:[#allocation5_spill] sm:$0xff] }
 0x24d   :  { %v904_v22 = vmul.f32 %v1200_v2, %v897_v63  ;;  %688 = vrot.lane.b32.xlu1 %v686_v46, %s1236_s15  ;;  %v1246_v63 = vmov 27  }
 0x24e   :  { %v937_v47 = vrot.slane %v933_v35, %v1873_v19 }
 0x24f   :  { %v908_v29 = vrot.slane %v904_v22, %v1873_v19 }
 0x251   :  { %910 = vrot.lane.b32.xlu1 %v908_v29, %s1236_s15 }
 0x255   :  { %939 = vrot.lane.b32.xlu1 %v937_v47, %s1236_s15 }
 0x2be   :  { %v723_v7 = vpop.permute.xlu0 %722 }
 0x2bf   :  { %v689_v50 = vpop.permute.xlu1 %688  ;;  %v725_v26 = vmul.f32 %v1729_v31, %v723_v7 }
 0x2c0   :  { %v691_v6 = vmul.f32 %v1729_v31, %v689_v50 }
 0x2c2   :  { %693 = vrot.lane.b32.xlu0 %v691_v6, %s1237_s18 }
 0x2c3   :  { %v911_v40 = vpop.permute.xlu1 %910 }
 0x2c4   :  { %v913_v8 = vmul.f32 %v1729_v31, %v911_v40 }
 0x2c6   :  { %727 = vrot.lane.b32.xlu0 %v725_v26, %s1230_s21  ;;  %915 = vrot.lane.b32.xlu1 %v913_v8, %s1237_s18 }
 0x2c7   :  { %v940_v41 = vpop.permute.xlu1 %939 }
 0x2c8   :  { %v942_v59 = vmul.f32 %v1729_v31, %v940_v41 }
 0x2ca   :  { %944 = vrot.lane.b32.xlu1 %v942_v59, %s1230_s21  ;;  %759 = vperm.xlu0 %1140, %v1729_v31  }
 0x2ce   :  { %745 = vperm.xlu1 %1139, %v1729_v31   ;;  %1141 = vset.pattern.permute.xlu0 %v1240_v1 }
 0x2d2   :  { %1142 = vset.pattern.permute.xlu1 %v1240_v1 }
 0x334   :  { %v694_v51 = vpop.permute.xlu0 %693 }
 0x335   :  { %v696_v55 = vadd.f32 %v1729_v31, %v694_v51 }
 0x338   :  { %v728_v30 = vpop.permute.xlu0 %727  ;;  %v916_v43 = vpop.permute.xlu1 %915 }
 0x339   :  { %v730_v62 = vadd.f32 %v728_v30, %v696_v55  ;;  %v918_v14 = vadd.f32 %v1729_v31, %v916_v43 }
 0x33b   :  { %v1084_v4 = vmul.f32 -1.442695, %v730_v62 }
 0x33c   :  { %v945_v13 = vpop.permute.xlu1 %944 }
 0x33d   :  { %1201 = vpow2.f32 %v1084_v4  ;;  %v947_v33 = vadd.f32 %v945_v13, %v918_v14 }
 0x33f   :  { %v1087_v56 = vmul.f32 -1.442695, %v947_v33 }
 0x341   :  { %1203 = vpow2.f32 %v1087_v56 }
 0x347   :  { %v1202_v52 = vpop.eup %1201 }
 0x348   :  { %v734_v18 = vadd.f32 1.0, %v1202_v52 }
 0x349   :  { %v760_v34 = vpop.permute.xlu0 %759 }
 0x34a   :  { %1205 = vrcp.f32 %v734_v18 }
 0x34b   :  { %v1204_v61 = vpop.eup %1203 }
 0x34c   :  { %v951_v44 = vadd.f32 1.0, %v1204_v61  ;;  %v1877_v61 = vld [vmem:[#allocation7_spill] sm:$0xff] }
 0x34d   :  { %v746_v9 = vpop.permute.xlu1 %745 }
 0x34e   :  { %1207 = vrcp.f32 %v951_v44 }
 0x354   :  { %v1206_v58 = vpop.eup %1205 }
 0x355   :  { %739 = vperm.xlu0 %1141, %v1206_v58  }
 0x358   :  { %v1208_v15 = vpop.eup %1207 }
 0x359   :  { %1145 = vset.pattern.permute.xlu0 %v1241_v45  ;;  %956 = vperm.xlu1 %1142, %v1208_v15  }
 0x35a   :  { %807 = vperm.xlu0 %1145, %v1729_v31  }
 0x35d   :  { %1143 = vset.pattern.permute.xlu1 %v1242_v32 }
 0x35e   :  { %1148 = vset.pattern.permute.xlu0 %v1243_v53  ;;  %775 = vperm.xlu1 %1143, %v1729_v31  }
 0x35f   :  { %855 = vperm.xlu0 %1148, %v1729_v31  }
 0x362   :  { %1144 = vset.pattern.permute.xlu1 %v1244_v0 }
 0x363   :  { %791 = vperm.xlu1 %1144, %v1729_v31   ;;  %1150 = vset.pattern.permute.xlu0 %v1240_v1 }
 0x367   :  { %1146 = vset.pattern.permute.xlu1 %v1245_v20 }
 0x368   :  { %823 = vperm.xlu1 %1146, %v1729_v31  }
 0x36c   :  { %1147 = vset.pattern.permute.xlu1 %v1246_v63 }
 0x36d   :  { %839 = vperm.xlu1 %1147, %v1729_v31  }
 0x371   :  { %1149 = vset.pattern.permute.xlu1 %v1247_v57 }
 0x372   :  { %871 = vperm.xlu1 %1149, %v1729_v31  }
 0x3d4   :  { %v740_v17 = vpop.permute.xlu0 %739 }
 0x3d5   :  { %v1749_v37 = vmul.f32 %v740_v17, %v1705_v49  ;;  %v1752_v60 = vmul.f32 %v740_v17, %v1707_v21  ;;  %v1875_v21 = vld [vmem:[#allocation4_spill] sm:$0xff] }
 0x3d7   :  { %v751_v16 = vrot.slane %v1749_v37, %v1873_v19  ;;  %v755_v38 = vrot.slane %v1752_v60, %v1873_v19  ;;  %v765_v3 = vrot.slane %v1749_v37, %v1874_v48  ;;  %v769_v12 = vrot.slane %v1752_v60, %v1874_v48 }
 0x3d8   :  { %v957_v42 = vpop.permute.xlu1 %956  ;;  %v813_v5 = vrot.slane %v1749_v37, %v1875_v21  ;;  %v817_v11 = vrot.slane %v1752_v60, %v1875_v21  ;;  %v781_v46 = vrot.slane %v1749_v37, %v1876_v28  ;;  %v785_v2 = vrot.slane %v1752_v60, %v1876_v28 }
 0x3d9   :  { %v1763_v24 = vmul.f32 %v957_v42, %v1711_v39  ;;  %v1766_v49 = vmul.f32 %v957_v42, %v1713_v10  ;;  %v756_v22 = vmul.f32 %v751_v16, %v746_v9  ;;  %v757_v35 = vmul.f32 %v755_v38, %v746_v9  ;;  %v808_v41 = vpop.permute.xlu0 %807 }
 0x3da   :  { %v770_v29 = vmul.f32 %v765_v3, %v760_v34  ;;  %v771_v47 = vmul.f32 %v769_v12, %v760_v34  ;;  %v818_v4 = vmul.f32 %v813_v5, %v808_v41  ;;  %v819_v14 = vmul.f32 %v817_v11, %v808_v41 }
 0x3db   :  { %v964_v39 = vrot.slane %v1763_v24, %v1873_v19  ;;  %v968_v10 = vrot.slane %v1766_v49, %v1873_v19  ;;  %v974_v50 = vrot.slane %v1763_v24, %v1874_v48  ;;  %v978_v31 = vrot.slane %v1766_v49, %v1874_v48 }
 0x3dc   :  { %v1010_v6 = vrot.slane %v1763_v24, %v1875_v21  ;;  %v1014_v7 = vrot.slane %v1766_v49, %v1875_v21  ;;  %v986_v54 = vrot.slane %v1763_v24, %v1876_v28  ;;  %v990_v36 = vrot.slane %v1766_v49, %v1876_v28 }
 0x3dd   :  { %v969_v40 = vmul.f32 %v964_v39, %v746_v9  ;;  %v970_v26 = vmul.f32 %v968_v10, %v746_v9  ;;  %v776_v8 = vpop.permute.xlu1 %775  ;;  %v979_v59 = vmul.f32 %v974_v50, %v760_v34  ;;  %v980_v19 = vmul.f32 %v978_v31, %v760_v34 }
 0x3de   :  { %v786_v1 = vmul.f32 %v781_v46, %v776_v8  ;;  %v787_v51 = vmul.f32 %v785_v2, %v776_v8  ;;  %v991_v43 = vmul.f32 %v986_v54, %v776_v8  ;;  %v992_v62 = vmul.f32 %v990_v36, %v776_v8  ;;  %v856_v31 = vpop.permute.xlu0 %855 }
 0x3df   :  { %v981_v55 = vadd.f32 %v979_v59, %v969_v40  ;;  %v982_v30 = vadd.f32 %v980_v19, %v970_v26  ;;  %v1015_v13 = vmul.f32 %v1010_v6, %v808_v41  ;;  %v1016_v33 = vmul.f32 %v1014_v7, %v808_v41 }
 0x3e0   :  { %v772_v56 = vadd.f32 %v770_v29, %v756_v22  ;;  %v773_v52 = vadd.f32 %v771_v47, %v757_v35  ;;  %v797_v44 = vrot.slane %v1749_v37, %v1877_v61  ;;  %v801_v58 = vrot.slane %v1752_v60, %v1877_v61 }
 0x3e1   :  { %v998_v15 = vrot.slane %v1763_v24, %v1877_v61  ;;  %v1002_v45 = vrot.slane %v1766_v49, %v1877_v61  ;;  %v993_v0 = vadd.f32 %v991_v43, %v981_v55  ;;  %v994_v20 = vadd.f32 %v992_v62, %v982_v30 }
 0x3e2   :  { %v792_v18 = vpop.permute.xlu1 %791  ;;  %v788_v32 = vadd.f32 %v786_v1, %v772_v56  ;;  %v789_v53 = vadd.f32 %v787_v51, %v773_v52  ;;  %v829_v17 = vrot.slane %v1749_v37, %v1304_v25  ;;  %v833_v16 = vrot.slane %v1752_v60, %v1304_v25 }
 0x3e3   :  { %v802_v63 = vmul.f32 %v797_v44, %v792_v18  ;;  %v803_v57 = vmul.f32 %v801_v58, %v792_v18  ;;  %v1003_v34 = vmul.f32 %v998_v15, %v792_v18  ;;  %v1004_v9 = vmul.f32 %v1002_v45, %v792_v18 }
 0x3e4   :  { %v1022_v38 = vrot.slane %v1763_v24, %v1304_v25  ;;  %v1026_v42 = vrot.slane %v1766_v49, %v1304_v25  ;;  %v861_v29 = vrot.slane %v1749_v37, %v1308_v27  ;;  %v865_v47 = vrot.slane %v1752_v60, %v1308_v27 }
 0x3e5   :  { %v804_v48 = vadd.f32 %v802_v63, %v788_v32  ;;  %v805_v3 = vadd.f32 %v803_v57, %v789_v53  ;;  %v1005_v12 = vadd.f32 %v1003_v34, %v993_v0  ;;  %v1006_v21 = vadd.f32 %v1004_v9, %v994_v20 }
 0x3e6   :  { %v1046_v25 = vrot.slane %v1763_v24, %v1308_v27  ;;  %v1050_v50 = vrot.slane %v1766_v49, %v1308_v27  ;;  %v845_v6 = vrot.slane %v1749_v37, %v1300_v23  ;;  %v849_v7 = vrot.slane %v1752_v60, %v1300_v23 }
 0x3e7   :  { %v824_v5 = vpop.permute.xlu1 %823  ;;  %v820_v22 = vadd.f32 %v818_v4, %v804_v48  ;;  %v821_v35 = vadd.f32 %v819_v14, %v805_v3  ;;  %v1017_v39 = vadd.f32 %v1015_v13, %v1005_v12  ;;  %v1018_v10 = vadd.f32 %v1016_v33, %v1006_v21  ;;  %v1211_v14 = vld [vmem:[%s1837_s0 + $0x8] sm:$0xff] }
 0x3e8   :  { %v834_v11 = vmul.f32 %v829_v17, %v824_v5  ;;  %v835_v28 = vmul.f32 %v833_v16, %v824_v5  ;;  %v1027_v46 = vmul.f32 %v1022_v38, %v824_v5  ;;  %v1028_v2 = vmul.f32 %v1026_v42, %v824_v5 }
 0x3e9   :  { %v1034_v40 = vrot.slane %v1763_v24, %v1300_v23  ;;  %v1038_v26 = vrot.slane %v1766_v49, %v1300_v23  ;;  %v866_v55 = vmul.f32 %v861_v29, %v856_v31  ;;  %v867_v37 = vmul.f32 %v865_v47, %v856_v31  ;;  %v1210_v23 = vld [vmem:[%s1837_s0] sm:$0xff] }
 0x3ea   :  { %v836_v8 = vadd.f32 %v834_v11, %v820_v22  ;;  %v837_v41 = vadd.f32 %v835_v28, %v821_v35  ;;  %v1029_v59 = vadd.f32 %v1027_v46, %v1017_v39  ;;  %v1030_v19 = vadd.f32 %v1028_v2, %v1018_v10 }
 0x3eb   :  { %v1051_v30 = vmul.f32 %v1046_v25, %v856_v31  ;;  %v1052_v43 = vmul.f32 %v1050_v50, %v856_v31  ;;  %v876_v49 = vcombine.high %v1210_v23, %v1210_v23  ;;  %v1057_v13 = vcombine.high %v1211_v14, %v1211_v14 }
 0x3ec   :  { %v840_v54 = vpop.permute.xlu1 %839 }
 0x3ed   :  { %v850_v36 = vmul.f32 %v845_v6, %v840_v54  ;;  %v851_v27 = vmul.f32 %v849_v7, %v840_v54  ;;  %v1039_v1 = vmul.f32 %v1034_v40, %v840_v54  ;;  %v1040_v51 = vmul.f32 %v1038_v26, %v840_v54 }
 0x3ef   :  { %v852_v60 = vadd.f32 %v850_v36, %v836_v8  ;;  %v853_v62 = vadd.f32 %v851_v27, %v837_v41  ;;  %v1041_v4 = vadd.f32 %v1039_v1, %v1029_v59  ;;  %v1042_v24 = vadd.f32 %v1040_v51, %v1030_v19 }
 0x3f1   :  { %v868_v33 = vadd.f32 %v866_v55, %v852_v60  ;;  %v869_v56 = vadd.f32 %v867_v37, %v853_v62  ;;  %v1053_v52 = vadd.f32 %v1051_v30, %v1041_v4  ;;  %v1054_v18 = vadd.f32 %v1052_v43, %v1042_v24  ;;  %v872_v61 = vpop.permute.xlu1 %871 }
 0x3f3   :  { %v874_v44 = vadd.f32 %v872_v61, %v868_v33  ;;  %v875_v58 = vadd.f32 %v872_v61, %v869_v56  ;;  %v1055_v15 = vadd.f32 %v1053_v52, %v872_v61  ;;  %v1056_v45 = vadd.f32 %v1054_v18, %v872_v61 }
 0x3f5   :  { %v878_v32 = vadd.f32 %v1210_v23, %v874_v44  ;;  %v879_v53 = vadd.f32 %v876_v49, %v875_v58  ;;  %v1059_v0 = vadd.f32 %v1211_v14, %v1055_v15  ;;  %v1060_v20 = vadd.f32 %v1057_v13, %v1056_v45 }
 0x3f7   :  { %v882_v63 = vcombine.low %v878_v32, %v879_v53  ;;  %v1063_v57 = vcombine.low %v1059_v0, %v1060_v20 }
 0x3f9   :  { %884 = vst [vmem:[%s1839_s3] sm:$0xff] %v882_v63  ;;  %1065 = vst [vmem:[%s1839_s3 + $0x8] sm:$0xff] %v1063_v57 }

</bundles_post_ra>
